<compile_context>
chip_gen: v6e
topology: v6e:2x2x1
jax: 0.10.0
libtpu: 0.0.40
codegen_flags: <defaults>
</compile_context>

<pallas_src>
import functools

import jax
import jax.numpy as jnp
import numpy as np
from jax.experimental import pallas as pl
from jax.experimental.pallas import tpu as pltpu

LEAKY_SLOPE = 0.2
BN_EPS = 1e-5
TM_MAX = 512  # M tile size (review: 512 reaches ~85% of HBM roofline vs ~63% at 256)


def _round_up(x, m):
    return (x + m - 1) // m * m


def _conv_out(n, k, s, p):
    return (n + 2 * p - k) // s + 1


# ---------------------------------------------------------------------------
# Pallas kernels:  out = act((x @ w) * scale + shift)
#   x: (TM, K) bf16, w: (K, N) bf16   -> native MXU bf16 path, f32 accumulation
#   scale/shift: (1, N) f32           -> BatchNorm-eval affine fused as epilogue
#   act = LeakyReLU(0.2) or identity; epilogue math in f32, cast at the store.
# ---------------------------------------------------------------------------
def _gemm_affine_act_kernel(x_ref, w_ref, scale_ref, shift_ref, o_ref, *, leaky):
    acc = jnp.dot(x_ref[...], w_ref[...], preferred_element_type=jnp.float32)
    y = acc * scale_ref[...] + shift_ref[...]
    if leaky:
        y = jnp.where(y >= 0, y, LEAKY_SLOPE * y)
    o_ref[...] = y.astype(o_ref.dtype)


def _gemm_act_kernel(x_ref, w_ref, o_ref, *, leaky):
    acc = jnp.dot(x_ref[...], w_ref[...], preferred_element_type=jnp.float32)
    if leaky:
        acc = jnp.where(acc >= 0, acc, LEAKY_SLOPE * acc)
    o_ref[...] = acc.astype(o_ref.dtype)


def fused_matmul(x, w, scale=None, shift=None, *, leaky=False, out_dtype=jnp.bfloat16):
    """act((x @ w) * scale + shift).  x:(M,K) bf16, w:(K,N) bf16, scale/shift:(N,) f32."""
    M, K = x.shape
    Kw, N = w.shape
    assert K == Kw, (K, Kw)

    if M <= TM_MAX:
        TM, Mp, xp = M, M, x                      # single full-extent block, no padding copy
    else:
        TM = TM_MAX
        Mp = _round_up(M, TM)
        xp = jnp.pad(x, ((0, Mp - M), (0, 0)))    # pad M only

    x_spec = pl.BlockSpec((TM, K), lambda i: (i, 0))
    w_spec = pl.BlockSpec((K, N), lambda i: (0, 0))
    o_spec = pl.BlockSpec((TM, N), lambda i: (i, 0))

    if scale is not None:
        s2 = scale.reshape(1, N).astype(jnp.float32)
        b2 = shift.reshape(1, N).astype(jnp.float32)
        a_spec = pl.BlockSpec((1, N), lambda i: (0, 0))
        kernel = functools.partial(_gemm_affine_act_kernel, leaky=leaky)
        in_specs = [x_spec, w_spec, a_spec, a_spec]
        args = (xp, w, s2, b2)
    else:
        # no-affine variant (first conv / final linear): skips pointless mul/add + 2 DMAs
        kernel = functools.partial(_gemm_act_kernel, leaky=leaky)
        in_specs = [x_spec, w_spec]
        args = (xp, w)

    out = pl.pallas_call(
        kernel,
        out_shape=jax.ShapeDtypeStruct((Mp, N), out_dtype),
        grid=(Mp // TM,),
        in_specs=in_specs,
        out_specs=o_spec,
        compiler_params=pltpu.CompilerParams(dimension_semantics=("parallel",)),
    )(*args)
    return out if Mp == M else out[:M]


def fused_matmul_ref(x, w, scale=None, shift=None, *, leaky=False, out_dtype=jnp.bfloat16):
    """Pure-JAX reference with matching numerics (bf16 operands, f32 accumulation)."""
    y = jnp.dot(x.astype(jnp.float32), w.astype(jnp.float32))
    if scale is not None:
        y = y * scale[None, :].astype(jnp.float32) + shift[None, :].astype(jnp.float32)
    if leaky:
        y = jnp.where(y >= 0, y, LEAKY_SLOPE * y)
    return y.astype(out_dtype)


# ---------------------------------------------------------------------------
# NHWC im2col (glue; small at these spatial sizes) + conv layer wrapper
# ---------------------------------------------------------------------------
def im2col_nhwc(x, kh, kw, sh, sw, ph, pw):
    """x: (B, H, W, C) -> (B*Ho*Wo, kh*kw*C); K order (kh, kw, C) matches prepped weights."""
    B, H, W, C = x.shape
    xp = jnp.pad(x, ((0, 0), (ph, ph), (pw, pw), (0, 0)))
    Ho = (H + 2 * ph - kh) // sh + 1
    Wo = (W + 2 * pw - kw) // sw + 1
    cols = []
    for i in range(kh):
        for j in range(kw):
            cols.append(xp[:, i:i + sh * (Ho - 1) + 1:sh, j:j + sw * (Wo - 1) + 1:sw, :])
    p = jnp.concatenate(cols, axis=-1)
    return p.reshape(B * Ho * Wo, kh * kw * C), Ho, Wo


def conv2d_nhwc(x, w_km, ksize, stride, padding, bn_affine, leaky, mm):
    """Conv2d(bias=False) on NHWC activations with a fused per-output-channel
    (BatchNorm-eval affine ->) LeakyReLU EPILOGUE, applied before any later zero padding
    (matches PyTorch's BN -> act -> conv(pad) ordering)."""
    B, H, W, C = x.shape
    kh, kw = ksize
    sh, sw = stride
    ph, pw = padding
    if (kh, kw, sh, sw, ph, pw) == (1, 1, 1, 1, 0, 0):
        patches, Ho, Wo = x.reshape(B * H * W, C), H, W        # 1x1 conv: plain GEMM
    else:
        patches, Ho, Wo = im2col_nhwc(x, kh, kw, sh, sw, ph, pw)
    scale, shift = bn_affine if bn_affine is not None else (None, None)
    y = mm(patches, w_km, scale, shift, leaky=leaky)
    return y.reshape(B, Ho, Wo, -1)


# ---------------------------------------------------------------------------
# Parameters: PyTorch-layout init, then a one-time prep into GEMM-ready bf16 weights
# ---------------------------------------------------------------------------
def init_params(key, in_dim, inner_dim):
    keys = jax.random.split(key, 5)

    def kaiming(k, shape):
        fan_in = 1
        for d in shape[1:]:
            fan_in *= d
        return ((2.0 / fan_in) ** 0.5) * jax.random.normal(k, shape, jnp.float32)

    def bn(c):  # running stats right after init_weight(): identity affine
        return dict(gamma=jnp.ones((c,), jnp.float32), beta=jnp.zeros((c,), jnp.float32),
                    mean=jnp.zeros((c,), jnp.float32), var=jnp.ones((c,), jnp.float32))

    flat_dim = inner_dim * 8 * 4 if in_dim < 256 else inner_dim * 8 * (in_dim // 256) * 3
    return dict(
        w1=kaiming(keys[0], (inner_dim, in_dim, 1, 1)),          # stem Conv2d (1,1) s(1,1)
        w2=kaiming(keys[1], (inner_dim * 2, inner_dim, 3, 3)),   # stem Conv2d (3,3) s(2,1) p1
        w3=kaiming(keys[2], (inner_dim * 4, inner_dim * 2, 3, 1)),  # convs[0] (3,1) s(2,1) p(1,0)
        w4=kaiming(keys[3], (inner_dim * 8, inner_dim * 4, 3, 3)),  # convs[1] (3,3) s(2,2) p1
        w_logit=kaiming(keys[4], (1, flat_dim)),                 # logit_out (no bias)
        bn0=bn(inner_dim * 2), bn1=bn(inner_dim * 4), bn2=bn(inner_dim * 8),
    )


def prep_params(params, time_dim, ndim):
    """One-time conversion: OIHW conv weights -> (kh*kw*Cin, Cout) bf16 GEMM weights matching
    the NHWC im2col K-order; BatchNorm(eval) folded to per-channel (scale, shift); logit weight
    permuted from torch's NCHW-flatten order to NHWC-flatten order and lane-padded to 128."""
    def prep_conv(w):
        cout, cin, kh, kw = w.shape
        return jnp.transpose(w, (2, 3, 1, 0)).reshape(kh * kw * cin, cout).astype(jnp.bfloat16)

    def bn_affine(bn):
        # TODO(synk): PyTorch BatchNorm1d would actually raise on 4D input; we implement the
        # intended per-channel eval-mode affine (BatchNorm2d-like) instead.
        scale = bn["gamma"] / jnp.sqrt(bn["var"] + BN_EPS)
        shift = bn["beta"] - bn["mean"] * scale
        return scale.astype(jnp.float32), shift.astype(jnp.float32)

    # final feature-map spatial dims (to re-order the NCHW-flatten logit weight)
    h = _conv_out(time_dim, 3, 2, 1); h = _conv_out(h, 3, 2, 1); hf = _conv_out(h, 3, 2, 1)
    w_ = _conv_out(ndim, 3, 1, 1);    w_ = _conv_out(w_, 1, 1, 0); wf = _conv_out(w_, 3, 2, 1)

    c_final = params["w4"].shape[0]
    flat_dim = params["w_logit"].shape[1]
    assert hf * wf * c_final == flat_dim, (hf, wf, c_final, flat_dim)
    wl = params["w_logit"].reshape(1, c_final, hf, wf)
    wl = jnp.transpose(wl, (0, 2, 3, 1)).reshape(1, flat_dim).T.astype(jnp.bfloat16)  # (K, 1)
    wl = jnp.pad(wl, ((0, 0), (0, 127)))  # pad N 1->128 once: lane-dense logit GEMM output

    return dict(
        w1=prep_conv(params["w1"]), w2=prep_conv(params["w2"]),
        w3=prep_conv(params["w3"]), w4=prep_conv(params["w4"]),
        w_logit=wl,
        bn0=bn_affine(params["bn0"]), bn1=bn_affine(params["bn1"]), bn2=bn_affine(params["bn2"]),
    )


# ---------------------------------------------------------------------------
# Forward: mirrors Discriminator3d.forward(x, sigmas=None), eval semantics
# ---------------------------------------------------------------------------
def discriminator3d_forward(prepped, x, use_pallas=True):
    if x.ndim == 3:
        x = x[:, None]                                        # == torch unsqueeze(1)
    x = jnp.transpose(x, (0, 2, 3, 1)).astype(jnp.bfloat16)   # one-time NCHW -> NHWC
    mm = fused_matmul if use_pallas else fused_matmul_ref
    p = prepped

    # stem Conv(1x1)        -> epilogue: stem LeakyReLU
    a = conv2d_nhwc(x, p["w1"], (1, 1), (1, 1), (0, 0), None, True, mm)
    # stem Conv(3x3,s(2,1)) -> epilogue: norms[0] BN(eval) + convs[0] LeakyReLU
    a = conv2d_nhwc(a, p["w2"], (3, 3), (2, 1), (1, 1), p["bn0"], True, mm)
    # convs[0] Conv(3x1)    -> epilogue: norms[1] BN(eval) + convs[1] LeakyReLU
    a = conv2d_nhwc(a, p["w3"], (3, 1), (2, 1), (1, 0), p["bn1"], True, mm)
    # convs[1] Conv(3x3)    -> epilogue: norms[2] BN(eval) + convs[2] LeakyReLU
    a = conv2d_nhwc(a, p["w4"], (3, 3), (2, 2), (1, 1), p["bn2"], True, mm)

    # flatten (NHWC order; logit weight was permuted to match torch's NCHW flatten)
    # -> Dropout(eval = identity) -> Linear(bias=False)
    b, hf, wf, cf = a.shape
    flat = a.reshape(b, hf * wf * cf)
    out = mm(flat, p["w_logit"], None, None, leaky=False, out_dtype=jnp.float32)
    return out[:, :1]


if __name__ == "__main__":
    # Small config: in_dim=128 (<256 -> Linear(inner_dim*8*4, 1)), inner_dim=32,
    # input (B, in_dim, time_dim, ndim) = (2, 128, 10, 4); final NHWC map (2,2,2,256) -> 1024.
    B, in_dim, inner_dim, time_dim, ndim = 2, 128, 32, 10, 4

    key = jax.random.PRNGKey(0)
    kp, kx = jax.random.split(key)
    params = init_params(kp, in_dim, inner_dim)
    prepped = prep_params(params, time_dim, ndim)
    x = jax.random.normal(kx, (B, in_dim, time_dim, ndim), jnp.float32)

    fwd = jax.jit(functools.partial(discriminator3d_forward, use_pallas=True))
    out = jax.block_until_ready(fwd(prepped, x))

    assert out.shape == (B, 1), out.shape
    assert bool(jnp.all(jnp.isfinite(out)))

    # Cross-check against a pure-JAX reference using identical bf16 operands.
    ref = jax.block_until_ready(discriminator3d_forward(prepped, x, use_pallas=False))
    np.testing.assert_allclose(np.asarray(out), np.asarray(ref), rtol=5e-2, atol=5e-2)

    print("KERNEL_OK")
</pallas_src>

<mosaic_0001>
module attributes {stable_mosaic.version = 11 : i64} {
  func.func @_gemm_act_kernel(%arg0: i32, %arg1: memref<80x128xbf16, #tpu.memory_space<vmem>>, %arg2: memref<128x32xbf16, #tpu.memory_space<vmem>>, %arg3: memref<80x32xbf16, #tpu.memory_space<vmem>>) attributes {dimension_semantics = [#tpu.dimension_semantics<parallel>], iteration_bounds = array<i64: 1>, scalar_prefetch = 0 : i64, scratch_operands = 0 : i64, tpu.core_type = #tpu.core_type<tc>, window_params = [{transform_indices = @transform_0, window_bounds = array<i64: 80, 128>}, {pipeline_mode = #tpu.pipeline_mode<synchronous>, transform_indices = @transform_1, window_bounds = array<i64: 128, 32>}, {transform_indices = @transform_2, window_bounds = array<i64: 80, 32>}]} {
    %c0 = arith.constant 0 : index
    %c0_0 = arith.constant 0 : index
    %0 = vector.load %arg1[%c0, %c0_0] : memref<80x128xbf16, #tpu.memory_space<vmem>>, vector<80x128xbf16>
    %c0_1 = arith.constant 0 : index
    %c0_2 = arith.constant 0 : index
    %1 = vector.load %arg2[%c0_1, %c0_2] : memref<128x32xbf16, #tpu.memory_space<vmem>>, vector<128x32xbf16>
    %cst = arith.constant dense<0.000000e+00> : vector<80x32xf32>
    %2 = tpu.matmul %0, %1, %cst {dimension_numbers = #tpu.dot_dimension_numbers<[1], [0], [0], [1], [0, 0, 1, 1], [], []>} : vector<80x128xbf16>, vector<128x32xbf16>, vector<80x32xf32> -> vector<80x32xf32>
    %cst_3 = arith.constant 0.000000e+00 : f32
    %3 = vector.broadcast %cst_3 : f32 to vector<80x32xf32>
    %4 = arith.cmpf oge, %2, %3 : vector<80x32xf32>
    %cst_4 = arith.constant 2.000000e-01 : f32
    %5 = vector.broadcast %cst_4 : f32 to vector<80x32xf32>
    %6 = arith.mulf %5, %2 : vector<80x32xf32>
    %7 = arith.select %4, %2, %6 : vector<80x32xi1>, vector<80x32xf32>
    %8 = arith.truncf %7 : vector<80x32xf32> to vector<80x32xbf16>
    %c0_5 = arith.constant 0 : index
    %c0_6 = arith.constant 0 : index
    %9 = vector.load %arg3[%c0_5, %c0_6] : memref<80x32xbf16, #tpu.memory_space<vmem>>, vector<80x32xbf16>
    tpu.vector_store %arg3[%c0_5, %c0_6], %8 {strides = array<i32>} : memref<80x32xbf16, #tpu.memory_space<vmem>>, vector<80x32xbf16>,
    return
  }
  func.func @transform_0(%arg0: i32) -> (i32, i32) {
    %c0_i32 = arith.constant 0 : i32
    %c0_i32_0 = arith.constant 0 : i32
    return %arg0, %c0_i32 : i32, i32
  }
  func.func @transform_1(%arg0: i32) -> (i32, i32) {
    %c0_i32 = arith.constant 0 : i32
    %c0_i32_0 = arith.constant 0 : i32
    %c0_i32_1 = arith.constant 0 : i32
    return %c0_i32, %c0_i32_0 : i32, i32
  }
  func.func @transform_2(%arg0: i32) -> (i32, i32) {
    %c0_i32 = arith.constant 0 : i32
    %c0_i32_0 = arith.constant 0 : i32
    return %arg0, %c0_i32 : i32, i32
  }
}

module attributes {stable_mosaic.version = 11 : i64} {
  func.func @_gemm_affine_act_kernel(%arg0: i32, %arg1: memref<40x288xbf16, #tpu.memory_space<vmem>>, %arg2: memref<288x64xbf16, #tpu.memory_space<vmem>>, %arg3: memref<1x64xf32, #tpu.memory_space<vmem>>, %arg4: memref<1x64xf32, #tpu.memory_space<vmem>>, %arg5: memref<40x64xbf16, #tpu.memory_space<vmem>>) attributes {dimension_semantics = [#tpu.dimension_semantics<parallel>], iteration_bounds = array<i64: 1>, scalar_prefetch = 0 : i64, scratch_operands = 0 : i64, tpu.core_type = #tpu.core_type<tc>, window_params = [{transform_indices = @transform_0, window_bounds = array<i64: 40, 288>}, {pipeline_mode = #tpu.pipeline_mode<synchronous>, transform_indices = @transform_1, window_bounds = array<i64: 288, 64>}, {pipeline_mode = #tpu.pipeline_mode<synchronous>, transform_indices = @transform_2, window_bounds = array<i64: 1, 64>}, {pipeline_mode = #tpu.pipeline_mode<synchronous>, transform_indices = @transform_3, window_bounds = array<i64: 1, 64>}, {transform_indices = @transform_4, window_bounds = array<i64: 40, 64>}]} {
    %c0 = arith.constant 0 : index
    %c0_0 = arith.constant 0 : index
    %0 = vector.load %arg1[%c0, %c0_0] : memref<40x288xbf16, #tpu.memory_space<vmem>>, vector<40x288xbf16>
    %c0_1 = arith.constant 0 : index
    %c0_2 = arith.constant 0 : index
    %1 = vector.load %arg2[%c0_1, %c0_2] : memref<288x64xbf16, #tpu.memory_space<vmem>>, vector<288x64xbf16>
    %cst = arith.constant dense<0.000000e+00> : vector<40x64xf32>
    %2 = tpu.matmul %0, %1, %cst {dimension_numbers = #tpu.dot_dimension_numbers<[1], [0], [0], [1], [0, 0, 1, 1], [], []>} : vector<40x288xbf16>, vector<288x64xbf16>, vector<40x64xf32> -> vector<40x64xf32>
    %c0_3 = arith.constant 0 : index
    %c0_4 = arith.constant 0 : index
    %3 = vector.load %arg3[%c0_3, %c0_4] : memref<1x64xf32, #tpu.memory_space<vmem>>, vector<1x64xf32>
    %4 = vector.broadcast %3 : vector<1x64xf32> to vector<40x64xf32>
    %5 = arith.mulf %2, %4 : vector<40x64xf32>
    %c0_5 = arith.constant 0 : index
    %c0_6 = arith.constant 0 : index
    %6 = vector.load %arg4[%c0_5, %c0_6] : memref<1x64xf32, #tpu.memory_space<vmem>>, vector<1x64xf32>
    %7 = vector.broadcast %6 : vector<1x64xf32> to vector<40x64xf32>
    %8 = arith.addf %5, %7 : vector<40x64xf32>
    %cst_7 = arith.constant 0.000000e+00 : f32
    %9 = vector.broadcast %cst_7 : f32 to vector<40x64xf32>
    %10 = arith.cmpf oge, %8, %9 : vector<40x64xf32>
    %cst_8 = arith.constant 2.000000e-01 : f32
    %11 = vector.broadcast %cst_8 : f32 to vector<40x64xf32>
    %12 = arith.mulf %11, %8 : vector<40x64xf32>
    %13 = arith.select %10, %8, %12 : vector<40x64xi1>, vector<40x64xf32>
    %14 = arith.truncf %13 : vector<40x64xf32> to vector<40x64xbf16>
    %c0_9 = arith.constant 0 : index
    %c0_10 = arith.constant 0 : index
    %15 = vector.load %arg5[%c0_9, %c0_10] : memref<40x64xbf16, #tpu.memory_space<vmem>>, vector<40x64xbf16>
    tpu.vector_store %arg5[%c0_9, %c0_10], %14 {strides = array<i32>} : memref<40x64xbf16, #tpu.memory_space<vmem>>, vector<40x64xbf16>,
    return
  }
  func.func @transform_0(%arg0: i32) -> (i32, i32) {
    %c0_i32 = arith.constant 0 : i32
    %c0_i32_0 = arith.constant 0 : i32
    return %arg0, %c0_i32 : i32, i32
  }
  func.func @transform_1(%arg0: i32) -> (i32, i32) {
    %c0_i32 = arith.constant 0 : i32
    %c0_i32_0 = arith.constant 0 : i32
    %c0_i32_1 = arith.constant 0 : i32
    return %c0_i32, %c0_i32_0 : i32, i32
  }
  func.func @transform_2(%arg0: i32) -> (i32, i32) {
    %c0_i32 = arith.constant 0 : i32
    %c0_i32_0 = arith.constant 0 : i32
    %c0_i32_1 = arith.constant 0 : i32
    return %c0_i32, %c0_i32_0 : i32, i32
  }
  func.func @transform_3(%arg0: i32) -> (i32, i32) {
    %c0_i32 = arith.constant 0 : i32
    %c0_i32_0 = arith.constant 0 : i32
    %c0_i32_1 = arith.constant 0 : i32
    return %c0_i32, %c0_i32_0 : i32, i32
  }
  func.func @transform_4(%arg0: i32) -> (i32, i32) {
    %c0_i32 = arith.constant 0 : i32
    %c0_i32_0 = arith.constant 0 : i32
    return %arg0, %c0_i32 : i32, i32
  }
}

module attributes {stable_mosaic.version = 11 : i64} {
  func.func @_gemm_affine_act_kernel(%arg0: i32, %arg1: memref<24x192xbf16, #tpu.memory_space<vmem>>, %arg2: memref<192x128xbf16, #tpu.memory_space<vmem>>, %arg3: memref<1x128xf32, #tpu.memory_space<vmem>>, %arg4: memref<1x128xf32, #tpu.memory_space<vmem>>, %arg5: memref<24x128xbf16, #tpu.memory_space<vmem>>) attributes {dimension_semantics = [#tpu.dimension_semantics<parallel>], iteration_bounds = array<i64: 1>, scalar_prefetch = 0 : i64, scratch_operands = 0 : i64, tpu.core_type = #tpu.core_type<tc>, window_params = [{transform_indices = @transform_0, window_bounds = array<i64: 24, 192>}, {pipeline_mode = #tpu.pipeline_mode<synchronous>, transform_indices = @transform_1, window_bounds = array<i64: 192, 128>}, {pipeline_mode = #tpu.pipeline_mode<synchronous>, transform_indices = @transform_2, window_bounds = array<i64: 1, 128>}, {pipeline_mode = #tpu.pipeline_mode<synchronous>, transform_indices = @transform_3, window_bounds = array<i64: 1, 128>}, {transform_indices = @transform_4, window_bounds = array<i64: 24, 128>}]} {
    %c0 = arith.constant 0 : index
    %c0_0 = arith.constant 0 : index
    %0 = vector.load %arg1[%c0, %c0_0] : memref<24x192xbf16, #tpu.memory_space<vmem>>, vector<24x192xbf16>
    %c0_1 = arith.constant 0 : index
    %c0_2 = arith.constant 0 : index
    %1 = vector.load %arg2[%c0_1, %c0_2] : memref<192x128xbf16, #tpu.memory_space<vmem>>, vector<192x128xbf16>
    %cst = arith.constant dense<0.000000e+00> : vector<24x128xf32>
    %2 = tpu.matmul %0, %1, %cst {dimension_numbers = #tpu.dot_dimension_numbers<[1], [0], [0], [1], [0, 0, 1, 1], [], []>} : vector<24x192xbf16>, vector<192x128xbf16>, vector<24x128xf32> -> vector<24x128xf32>
    %c0_3 = arith.constant 0 : index
    %c0_4 = arith.constant 0 : index
    %3 = vector.load %arg3[%c0_3, %c0_4] : memref<1x128xf32, #tpu.memory_space<vmem>>, vector<1x128xf32>
    %4 = vector.broadcast %3 : vector<1x128xf32> to vector<24x128xf32>
    %5 = arith.mulf %2, %4 : vector<24x128xf32>
    %c0_5 = arith.constant 0 : index
    %c0_6 = arith.constant 0 : index
    %6 = vector.load %arg4[%c0_5, %c0_6] : memref<1x128xf32, #tpu.memory_space<vmem>>, vector<1x128xf32>
    %7 = vector.broadcast %6 : vector<1x128xf32> to vector<24x128xf32>
    %8 = arith.addf %5, %7 : vector<24x128xf32>
    %cst_7 = arith.constant 0.000000e+00 : f32
    %9 = vector.broadcast %cst_7 : f32 to vector<24x128xf32>
    %10 = arith.cmpf oge, %8, %9 : vector<24x128xf32>
    %cst_8 = arith.constant 2.000000e-01 : f32
    %11 = vector.broadcast %cst_8 : f32 to vector<24x128xf32>
    %12 = arith.mulf %11, %8 : vector<24x128xf32>
    %13 = arith.select %10, %8, %12 : vector<24x128xi1>, vector<24x128xf32>
    %14 = arith.truncf %13 : vector<24x128xf32> to vector<24x128xbf16>
    %c0_9 = arith.constant 0 : index
    %c0_10 = arith.constant 0 : index
    %15 = vector.load %arg5[%c0_9, %c0_10] : memref<24x128xbf16, #tpu.memory_space<vmem>>, vector<24x128xbf16>
    tpu.vector_store %arg5[%c0_9, %c0_10], %14 {strides = array<i32>} : memref<24x128xbf16, #tpu.memory_space<vmem>>, vector<24x128xbf16>,
    return
  }
  func.func @transform_0(%arg0: i32) -> (i32, i32) {
    %c0_i32 = arith.constant 0 : i32
    %c0_i32_0 = arith.constant 0 : i32
    return %arg0, %c0_i32 : i32, i32
  }
  func.func @transform_1(%arg0: i32) -> (i32, i32) {
    %c0_i32 = arith.constant 0 : i32
    %c0_i32_0 = arith.constant 0 : i32
    %c0_i32_1 = arith.constant 0 : i32
    return %c0_i32, %c0_i32_0 : i32, i32
  }
  func.func @transform_2(%arg0: i32) -> (i32, i32) {
    %c0_i32 = arith.constant 0 : i32
    %c0_i32_0 = arith.constant 0 : i32
    %c0_i32_1 = arith.constant 0 : i32
    return %c0_i32, %c0_i32_0 : i32, i32
  }
  func.func @transform_3(%arg0: i32) -> (i32, i32) {
    %c0_i32 = arith.constant 0 : i32
    %c0_i32_0 = arith.constant 0 : i32
    %c0_i32_1 = arith.constant 0 : i32
    return %c0_i32, %c0_i32_0 : i32, i32
  }
  func.func @transform_4(%arg0: i32) -> (i32, i32) {
    %c0_i32 = arith.constant 0 : i32
    %c0_i32_0 = arith.constant 0 : i32
    return %arg0, %c0_i32 : i32, i32
  }
}

module attributes {stable_mosaic.version = 11 : i64} {
  func.func @_gemm_affine_act_kernel(%arg0: i32, %arg1: memref<8x1152xbf16, #tpu.memory_space<vmem>>, %arg2: memref<1152x256xbf16, #tpu.memory_space<vmem>>, %arg3: memref<1x256xf32, #tpu.memory_space<vmem>>, %arg4: memref<1x256xf32, #tpu.memory_space<vmem>>, %arg5: memref<8x256xbf16, #tpu.memory_space<vmem>>) attributes {dimension_semantics = [#tpu.dimension_semantics<parallel>], iteration_bounds = array<i64: 1>, scalar_prefetch = 0 : i64, scratch_operands = 0 : i64, tpu.core_type = #tpu.core_type<tc>, window_params = [{transform_indices = @transform_0, window_bounds = array<i64: 8, 1152>}, {pipeline_mode = #tpu.pipeline_mode<synchronous>, transform_indices = @transform_1, window_bounds = array<i64: 1152, 256>}, {pipeline_mode = #tpu.pipeline_mode<synchronous>, transform_indices = @transform_2, window_bounds = array<i64: 1, 256>}, {pipeline_mode = #tpu.pipeline_mode<synchronous>, transform_indices = @transform_3, window_bounds = array<i64: 1, 256>}, {transform_indices = @transform_4, window_bounds = array<i64: 8, 256>}]} {
    %c0 = arith.constant 0 : index
    %c0_0 = arith.constant 0 : index
    %0 = vector.load %arg1[%c0, %c0_0] : memref<8x1152xbf16, #tpu.memory_space<vmem>>, vector<8x1152xbf16>
    %c0_1 = arith.constant 0 : index
    %c0_2 = arith.constant 0 : index
    %1 = vector.load %arg2[%c0_1, %c0_2] : memref<1152x256xbf16, #tpu.memory_space<vmem>>, vector<1152x256xbf16>
    %cst = arith.constant dense<0.000000e+00> : vector<8x256xf32>
    %2 = tpu.matmul %0, %1, %cst {dimension_numbers = #tpu.dot_dimension_numbers<[1], [0], [0], [1], [0, 0, 1, 1], [], []>} : vector<8x1152xbf16>, vector<1152x256xbf16>, vector<8x256xf32> -> vector<8x256xf32>
    %c0_3 = arith.constant 0 : index
    %c0_4 = arith.constant 0 : index
    %3 = vector.load %arg3[%c0_3, %c0_4] : memref<1x256xf32, #tpu.memory_space<vmem>>, vector<1x256xf32>
    %4 = vector.broadcast %3 : vector<1x256xf32> to vector<8x256xf32>
    %5 = arith.mulf %2, %4 : vector<8x256xf32>
    %c0_5 = arith.constant 0 : index
    %c0_6 = arith.constant 0 : index
    %6 = vector.load %arg4[%c0_5, %c0_6] : memref<1x256xf32, #tpu.memory_space<vmem>>, vector<1x256xf32>
    %7 = vector.broadcast %6 : vector<1x256xf32> to vector<8x256xf32>
    %8 = arith.addf %5, %7 : vector<8x256xf32>
    %cst_7 = arith.constant 0.000000e+00 : f32
    %9 = vector.broadcast %cst_7 : f32 to vector<8x256xf32>
    %10 = arith.cmpf oge, %8, %9 : vector<8x256xf32>
    %cst_8 = arith.constant 2.000000e-01 : f32
    %11 = vector.broadcast %cst_8 : f32 to vector<8x256xf32>
    %12 = arith.mulf %11, %8 : vector<8x256xf32>
    %13 = arith.select %10, %8, %12 : vector<8x256xi1>, vector<8x256xf32>
    %14 = arith.truncf %13 : vector<8x256xf32> to vector<8x256xbf16>
    %c0_9 = arith.constant 0 : index
    %c0_10 = arith.constant 0 : index
    %15 = vector.load %arg5[%c0_9, %c0_10] : memref<8x256xbf16, #tpu.memory_space<vmem>>, vector<8x256xbf16>
    tpu.vector_store %arg5[%c0_9, %c0_10], %14 {strides = array<i32>} : memref<8x256xbf16, #tpu.memory_space<vmem>>, vector<8x256xbf16>,
    return
  }
  func.func @transform_0(%arg0: i32) -> (i32, i32) {
    %c0_i32 = arith.constant 0 : i32
    %c0_i32_0 = arith.constant 0 : i32
    return %arg0, %c0_i32 : i32, i32
  }
  func.func @transform_1(%arg0: i32) -> (i32, i32) {
    %c0_i32 = arith.constant 0 : i32
    %c0_i32_0 = arith.constant 0 : i32
    %c0_i32_1 = arith.constant 0 : i32
    return %c0_i32, %c0_i32_0 : i32, i32
  }
  func.func @transform_2(%arg0: i32) -> (i32, i32) {
    %c0_i32 = arith.constant 0 : i32
    %c0_i32_0 = arith.constant 0 : i32
    %c0_i32_1 = arith.constant 0 : i32
    return %c0_i32, %c0_i32_0 : i32, i32
  }
  func.func @transform_3(%arg0: i32) -> (i32, i32) {
    %c0_i32 = arith.constant 0 : i32
    %c0_i32_0 = arith.constant 0 : i32
    %c0_i32_1 = arith.constant 0 : i32
    return %c0_i32, %c0_i32_0 : i32, i32
  }
  func.func @transform_4(%arg0: i32) -> (i32, i32) {
    %c0_i32 = arith.constant 0 : i32
    %c0_i32_0 = arith.constant 0 : i32
    return %arg0, %c0_i32 : i32, i32
  }
}

module attributes {stable_mosaic.version = 11 : i64} {
  func.func @_gemm_act_kernel(%arg0: i32, %arg1: memref<2x1024xbf16, #tpu.memory_space<vmem>>, %arg2: memref<1024x128xbf16, #tpu.memory_space<vmem>>, %arg3: memref<2x128xf32, #tpu.memory_space<vmem>>) attributes {dimension_semantics = [#tpu.dimension_semantics<parallel>], iteration_bounds = array<i64: 1>, scalar_prefetch = 0 : i64, scratch_operands = 0 : i64, tpu.core_type = #tpu.core_type<tc>, window_params = [{transform_indices = @transform_0, window_bounds = array<i64: 2, 1024>}, {pipeline_mode = #tpu.pipeline_mode<synchronous>, transform_indices = @transform_1, window_bounds = array<i64: 1024, 128>}, {transform_indices = @transform_2, window_bounds = array<i64: 2, 128>}]} {
    %c0 = arith.constant 0 : index
    %c0_0 = arith.constant 0 : index
    %0 = vector.load %arg1[%c0, %c0_0] : memref<2x1024xbf16, #tpu.memory_space<vmem>>, vector<2x1024xbf16>
    %c0_1 = arith.constant 0 : index
    %c0_2 = arith.constant 0 : index
    %1 = vector.load %arg2[%c0_1, %c0_2] : memref<1024x128xbf16, #tpu.memory_space<vmem>>, vector<1024x128xbf16>
    %cst = arith.constant dense<0.000000e+00> : vector<2x128xf32>
    %2 = tpu.matmul %0, %1, %cst {dimension_numbers = #tpu.dot_dimension_numbers<[1], [0], [0], [1], [0, 0, 1, 1], [], []>} : vector<2x1024xbf16>, vector<1024x128xbf16>, vector<2x128xf32> -> vector<2x128xf32>
    %c0_3 = arith.constant 0 : index
    %c0_4 = arith.constant 0 : index
    %3 = vector.load %arg3[%c0_3, %c0_4] : memref<2x128xf32, #tpu.memory_space<vmem>>, vector<2x128xf32>
    tpu.vector_store %arg3[%c0_3, %c0_4], %2 {strides = array<i32>} : memref<2x128xf32, #tpu.memory_space<vmem>>, vector<2x128xf32>,
    return
  }
  func.func @transform_0(%arg0: i32) -> (i32, i32) {
    %c0_i32 = arith.constant 0 : i32
    %c0_i32_0 = arith.constant 0 : i32
    return %arg0, %c0_i32 : i32, i32
  }
  func.func @transform_1(%arg0: i32) -> (i32, i32) {
    %c0_i32 = arith.constant 0 : i32
    %c0_i32_0 = arith.constant 0 : i32
    %c0_i32_1 = arith.constant 0 : i32
    return %c0_i32, %c0_i32_0 : i32, i32
  }
  func.func @transform_2(%arg0: i32) -> (i32, i32) {
    %c0_i32 = arith.constant 0 : i32
    %c0_i32_0 = arith.constant 0 : i32
    return %arg0, %c0_i32 : i32, i32
  }
}

</mosaic_0001>

<bundles_post_ra>
// kernel: discriminator3d_forward.5
= control target key start
LH: loop header
LB: loop body
LE: loop exit
PB: predicated region body
PF: predicated region fallthrough
CT: control target
= control target key end

     0   :  { %v387_v0 = vmov 0.0   ;;  %vm388_vm0 = vmmov 0   ;;  %vm259_vm3 = vcmask 257024   ;;  %s488_s1 = inlined_call_operand.vmem [shape: bf16[128,32], index: 1, kind: input, shape index: {}]   ;;  %s489_s0 = inlined_call_operand.vmem [shape: bf16[80,128], index: 0, kind: input, shape index: {}]   ;;  %s490_s2 = inlined_call_operand.vmem [shape: bf16[80,32], index: 2, kind: output, shape index: {}]  }
   0x1   :  { %320 = vmatprep.subr.bf16.mxu0 %v387_v0  ;;  %v374_v1 = vld [vmem:[%s488_s1 + $0x38] sm:$0xff]   ;;  %356 = vmatprep.subr.bf16.mxu1 %v387_v0  ;;  %v375_v2 = vld [vmem:[%s488_s1 + $0x30] sm:$0xff]   ;;  %v376_v3 = vld [vmem:[%s488_s1 + $0x28] sm:$0xff]  }
   0x2   :  { %336 = vmatprep.mubr.msk.bf16.mxu0 %vm388_vm0, %v387_v0  ;;  %348 = vmatprep.mubr.msk.bf16.mxu1 %vm388_vm0, %v387_v0  ;;  %v377_v4 = vld [vmem:[%s488_s1 + $0x20] sm:$0xff]   ;;  %v378_v5 = vld [vmem:[%s488_s1 + $0x18] sm:$0xff]   ;;  %v379_v6 = vld [vmem:[%s488_s1 + $0x10] sm:$0xff]  }
   0x3   :  { %321 = vmatpush3.bf16.msra.mxu0 %v374_v1  ;;  %364 = vmatpush3.bf16.msra.mxu1 %v374_v1  ;;  %v380_v7 = vld [vmem:[%s488_s1 + $0x8] sm:$0xff]   ;;  %v381_v8 = vld [vmem:[%s488_s1] sm:$0xff]   ;;  %v383_v10 = vld [vmem:[%s489_s0 + $0x18] sm:$0xff]  }
   0x4   :  { %322 = vmatprep.subr.bf16.mxu0 %v387_v0  ;;  %357 = vmatprep.subr.bf16.mxu1 %v387_v0  ;;  %v382_v9 = vld [vmem:[%s489_s0] sm:$0xff]   ;;  %v384_v11 = vld [vmem:[%s489_s0 + $0x8] sm:$0xff]   ;;  %v386_v13 = vld [vmem:[%s489_s0 + $0x10] sm:$0xff]  }
   0x5   :  { %v385_v12 = vld [vmem:[%s489_s0 + $0x20] sm:$0xff]  }
   0x7   :  { %323 = vmatpush3.bf16.msra.mxu0 %v375_v2  ;;  %365 = vmatpush3.bf16.msra.mxu1 %v375_v2 }
   0x8   :  { %324 = vmatprep.subr.bf16.mxu0 %v387_v0  ;;  %358 = vmatprep.subr.bf16.mxu1 %v387_v0 }
   0xb   :  { %325 = vmatpush3.bf16.msra.mxu0 %v376_v3  ;;  %366 = vmatpush3.bf16.msra.mxu1 %v376_v3 }
   0xc   :  { %326 = vmatprep.subr.bf16.mxu0 %v387_v0  ;;  %359 = vmatprep.subr.bf16.mxu1 %v387_v0 }
   0xf   :  { %327 = vmatpush3.bf16.msra.mxu0 %v377_v4  ;;  %367 = vmatpush3.bf16.msra.mxu1 %v377_v4 }
  0x10   :  { %328 = vmatprep.subr.bf16.mxu0 %v387_v0  ;;  %360 = vmatprep.subr.bf16.mxu1 %v387_v0 }
  0x13   :  { %329 = vmatpush3.bf16.msra.mxu0 %v378_v5  ;;  %368 = vmatpush3.bf16.msra.mxu1 %v378_v5 }
  0x14   :  { %330 = vmatprep.subr.bf16.mxu0 %v387_v0  ;;  %361 = vmatprep.subr.bf16.mxu1 %v387_v0 }
  0x17   :  { %331 = vmatpush3.bf16.msra.mxu0 %v379_v6  ;;  %369 = vmatpush3.bf16.msra.mxu1 %v379_v6 }
  0x18   :  { %332 = vmatprep.subr.bf16.mxu0 %v387_v0  ;;  %362 = vmatprep.subr.bf16.mxu1 %v387_v0 }
  0x1b   :  { %333 = vmatpush3.bf16.msra.mxu0 %v380_v7  ;;  %370 = vmatpush3.bf16.msra.mxu1 %v380_v7 }
  0x1c   :  { %334 = vmatprep.subr.bf16.mxu0 %v387_v0  ;;  %363 = vmatprep.subr.bf16.mxu1 %v387_v0 }
  0x1f   :  { %335 = vmatpush3.bf16.msra.mxu0 %v381_v8  ;;  %371 = vmatpush3.bf16.msra.mxu1 %v381_v8 }
  0x22   :  { %337 = vmatmul.mubr.bf16.vlgmr.msra.gmra.mxu0 %v382_v9  ;;  %349 = vmatmul.mubr.bf16.vlgmr.msra.gmra.mxu1 %v383_v10 }
  0x23   :  { %340 = vmatprep.mubr.msk.bf16.mxu0 %vm388_vm0, %v387_v0  ;;  %352 = vmatprep.mubr.msk.bf16.mxu1 %vm388_vm0, %v387_v0 }
  0x2a   :  { %341 = vmatmul.mubr.bf16.gmra.mxu0 %v384_v11  ;;  %353 = vmatmul.mubr.bf16.gmra.mxu1 %v385_v12 }
  0x2b   :  { %344 = vmatprep.mubr.msk.bf16.mxu0 %vm388_vm0, %v387_v0 }
  0x32   :  { %345 = vmatmul.mubr.bf16.gmra.mxu0 %v386_v13 }
  0xe2   :  { %v150_v14 = vpop.f32.mrf.mxu0  ;;  %v174_v15 = vpop.f32.mrf.mxu1 }
  0xe3   :  { %vm189_vm1 = vcmp.ge.f32.partialorder %v150_v14, 0.0  ;;  %v199_v16 = vmul.f32 0.2, %v150_v14  ;;  %vm195_vm2 = vcmp.ge.f32.partialorder %v174_v15, 0.0  ;;  %v205_v17 = vmul.f32 0.2, %v174_v15 }
  0xe4   :  { %v338_v18 = vpop.f32.mrf.mxu0  ;;  %v350_v19 = vpop.f32.mrf.mxu1 }
  0xe5   :  { %v209_v20 = vsel %vm189_vm1, %v150_v14, %v199_v16  ;;  %v215_v21 = vsel %vm195_vm2, %v174_v15, %v205_v17 }
  0xe6   :  { %v297_v22 = vpack.c.bf16 %v209_v20, %v209_v20  ;;  %v303_v23 = vpack.c.bf16 %v215_v21, %v215_v21  ;;  %v153_v24 = vpop.f32.mrf.mxu0  ;;  %v177_v25 = vpop.f32.mrf.mxu1 }
  0xe7   :  { %vm190_vm4 = vcmp.ge.f32.partialorder %v153_v24, 0.0  ;;  %v200_v26 = vmul.f32 0.2, %v153_v24  ;;  %vm196_vm5 = vcmp.ge.f32.partialorder %v177_v25, 0.0  ;;  %v206_v27 = vmul.f32 0.2, %v177_v25 }
  0xe8   :  { %260 = vst.msk [vmem:[%s490_s2] sm:$0xf] %vm259_vm3, %v297_v22  ;;  %266 = vst.msk [vmem:[%s490_s2 + $0x18] sm:$0xf] %vm259_vm3, %v303_v23  ;;  %v339_v28 = vpop.f32.mrf.mxu0  ;;  %v351_v29 = vpop.f32.mrf.mxu1 }
  0xe9   :  { %v210_v30 = vsel %vm190_vm4, %v153_v24, %v200_v26  ;;  %v216_v31 = vsel %vm196_vm5, %v177_v25, %v206_v27 }
  0xea   :  { %v298_v32 = vpack.c.bf16 %v210_v30, %v210_v30  ;;  %v304_v33 = vpack.c.bf16 %v216_v31, %v216_v31  ;;  %v158_v34 = vpop.f32.mrf.mxu0  ;;  %v182_v35 = vpop.f32.mrf.mxu1 }
  0xeb   :  { %vm191_vm6 = vcmp.ge.f32.partialorder %v158_v34, 0.0  ;;  %v201_v36 = vmul.f32 0.2, %v158_v34  ;;  %vm197_vm7 = vcmp.ge.f32.partialorder %v182_v35, 0.0  ;;  %v207_v37 = vmul.f32 0.2, %v182_v35 }
  0xec   :  { %261 = vst.msk [vmem:[%s490_s2 + $0x4] sm:$0xf] %vm259_vm3, %v298_v32  ;;  %267 = vst.msk [vmem:[%s490_s2 + $0x1c] sm:$0xf] %vm259_vm3, %v304_v33  ;;  %v342_v38 = vpop.f32.mrf.mxu0  ;;  %v354_v39 = vpop.f32.mrf.mxu1 }
  0xed   :  { %v211_v40 = vsel %vm191_vm6, %v158_v34, %v201_v36  ;;  %v217_v41 = vsel %vm197_vm7, %v182_v35, %v207_v37 }
  0xee   :  { %v299_v42 = vpack.c.bf16 %v211_v40, %v211_v40  ;;  %v305_v43 = vpack.c.bf16 %v217_v41, %v217_v41  ;;  %v161_v44 = vpop.f32.mrf.mxu0  ;;  %v185_v45 = vpop.f32.mrf.mxu1 }
  0xef   :  { %vm192_vm8 = vcmp.ge.f32.partialorder %v161_v44, 0.0  ;;  %v202_v46 = vmul.f32 0.2, %v161_v44  ;;  %vm198_vm9 = vcmp.ge.f32.partialorder %v185_v45, 0.0  ;;  %v208_v47 = vmul.f32 0.2, %v185_v45 }
  0xf0   :  { %262 = vst.msk [vmem:[%s490_s2 + $0x8] sm:$0xf] %vm259_vm3, %v299_v42  ;;  %268 = vst.msk [vmem:[%s490_s2 + $0x20] sm:$0xf] %vm259_vm3, %v305_v43  ;;  %v343_v48 = vpop.f32.mrf.mxu0  ;;  %v355_v49 = vpop.f32.mrf.mxu1 }
  0xf1   :  { %v212_v50 = vsel %vm192_vm8, %v161_v44, %v202_v46  ;;  %v218_v51 = vsel %vm198_vm9, %v185_v45, %v208_v47 }
  0xf2   :  { %v300_v52 = vpack.c.bf16 %v212_v50, %v212_v50  ;;  %v306_v53 = vpack.c.bf16 %v218_v51, %v218_v51  ;;  %v166_v54 = vpop.f32.mrf.mxu0 }
  0xf3   :  { %vm193_vm10 = vcmp.ge.f32.partialorder %v166_v54, 0.0  ;;  %v203_v55 = vmul.f32 0.2, %v166_v54 }
  0xf4   :  { %263 = vst.msk [vmem:[%s490_s2 + $0xc] sm:$0xf] %vm259_vm3, %v300_v52  ;;  %269 = vst.msk [vmem:[%s490_s2 + $0x24] sm:$0xf] %vm259_vm3, %v306_v53  ;;  %v346_v56 = vpop.f32.mrf.mxu0 }
  0xf5   :  { %v213_v57 = vsel %vm193_vm10, %v166_v54, %v203_v55 }
  0xf6   :  { %v301_v58 = vpack.c.bf16 %v213_v57, %v213_v57  ;;  %v169_v59 = vpop.f32.mrf.mxu0 }
  0xf7   :  { %vm194_vm11 = vcmp.ge.f32.partialorder %v169_v59, 0.0  ;;  %v204_v60 = vmul.f32 0.2, %v169_v59 }
  0xf8   :  { %264 = vst.msk [vmem:[%s490_s2 + $0x10] sm:$0xf] %vm259_vm3, %v301_v58  ;;  %v347_v61 = vpop.f32.mrf.mxu0 }
  0xf9   :  { %v214_v62 = vsel %vm194_vm11, %v169_v59, %v204_v60 }
  0xfa   :  { %v302_v63 = vpack.c.bf16 %v214_v62, %v214_v62 }
  0xfc   :  { %265 = vst.msk [vmem:[%s490_s2 + $0x14] sm:$0xf] %vm259_vm3, %v302_v63 }

// kernel: discriminator3d_forward.6
= control target key start
LH: loop header
LB: loop body
LE: loop exit
PB: predicated region body
PF: predicated region fallthrough
CT: control target
= control target key end

     0   :  { %v532_v1 = vmov 0.0   ;;  %vm533_vm0 = vmmov 0   ;;  %vm212_vm1 = vcmask 261120   ;;  %vm394_vm3 = vcmask 519168   ;;  %s669_s1 = inlined_call_operand.vmem [shape: bf16[288,64], index: 1, kind: input, shape index: {}]   ;;  %s670_s0 = inlined_call_operand.vmem [shape: bf16[40,288], index: 0, kind: input, shape index: {}]   ;;  %s671_s2 = inlined_call_operand.vmem [shape: f32[1,64], index: 2, kind: input, shape index: {}]   ;;  %s672_s3 = inlined_call_operand.vmem [shape: f32[1,64], index: 3, kind: input, shape index: {}]   ;;  %s673_s4 = inlined_call_operand.vmem [shape: bf16[40,64], index: 4, kind: output, shape index: {}]  }
   0x1   :  { %v503_v0 = vld [vmem:[%s669_s1 + $0x78] sm:$0xff]   ;;  %485 = vmatprep.subr.bf16.mxu1 %v532_v1  ;;  %489 = vmatprep.mubr.msk.bf16.mxu1 %vm533_vm0, %v532_v1  ;;  %v505_v3 = vld [vmem:[%s669_s1 + $0x70] sm:$0xff]   ;;  %v507_v5 = vld [vmem:[%s669_s1 + $0x68] sm:$0xff]  }
   0x2   :  { %v504_v2 = vld [vmem:[%s669_s1 + $0x38] sm:$0xff]   ;;  %446 = vmatprep.subr.bf16.mxu0 %v503_v0  ;;  %v506_v4 = vld [vmem:[%s669_s1 + $0x30] sm:$0xff]   ;;  %v508_v6 = vld [vmem:[%s669_s1 + $0x28] sm:$0xff]  }
   0x3   :  { %447 = vmatpush3.bf16.msra.mxu0 %v504_v2  ;;  %v509_v7 = vld [vmem:[%s669_s1 + $0x60] sm:$0xff]   ;;  %v511_v9 = vld [vmem:[%s669_s1 + $0x58] sm:$0xff]   ;;  %v515_v10 = vld [vmem:[%s669_s1 + $0x88] sm:$0xff]  }
   0x4   :  { %448 = vmatprep.subr.bf16.mxu0 %v505_v3  ;;  %v510_v8 = vld [vmem:[%s669_s1 + $0x20] sm:$0xff]   ;;  %v512_v11 = vld [vmem:[%s669_s1 + $0x18] sm:$0xff]   ;;  %486 = vmatpush3.bf16.msra.mxu1 %v515_v10  ;;  %v513_v13 = vld [vmem:[%s669_s1 + $0x50] sm:$0xff]  }
   0x5   :  { %487 = vmatprep.subr.bf16.mxu1 %v532_v1  ;;  %v518_v12 = vld [vmem:[%s669_s1 + $0x80] sm:$0xff]   ;;  %v514_v14 = vld [vmem:[%s669_s1 + $0x10] sm:$0xff]   ;;  %v516_v16 = vld [vmem:[%s669_s1 + $0x48] sm:$0xff]  }
   0x6   :  { %v521_v15 = vld [vmem:[%s670_s0 + $0x8] ss:$12 sps:$4 sm:$0xff]   ;;  %v524_v17 = vld [vmem:[%s670_s0 + $0x4] ss:$12 sps:$4 sm:$0xff]   ;;  %v525_v20 = vld [vmem:[%s670_s0 + $0x20] ss:$12 sps:$4 sm:$0xff]  }
   0x7   :  { %449 = vmatpush3.bf16.msra.mxu0 %v506_v4  ;;  %254 = vmatprep.mubr.bf16.mxu0 %v524_v17  ;;  %v517_v18 = vld [vmem:[%s669_s1 + $0x8] sm:$0xff]   ;;  %v519_v19 = vld [vmem:[%s669_s1 + $0x40] sm:$0xff]   ;;  %v529_v24 = vld [vmem:[%s670_s0 + $0x38] ss:$0 sps:$4 sm:$0xff]  }
   0x8   :  { %450 = vmatprep.subr.bf16.mxu0 %v507_v5  ;;  %488 = vmatpush3.bf16.msra.mxu1 %v518_v12  ;;  %v520_v21 = vld [vmem:[%s669_s1] sm:$0xff]   ;;  %v526_v23 = vld [vmem:[%s670_s0 + $0x1c] ss:$12 sps:$4 sm:$0xff]   ;;  %v26_v25 = vld [vmem:[%s670_s0 + $0x30] sm:$0xff] }
   0x9   :  { %v522_v22 = vld [vmem:[%s670_s0] ss:$12 sps:$4 sm:$0xff]   ;;  %v528_v26 = vld [vmem:[%s670_s0 + $0x18] ss:$12 sps:$4 sm:$0xff]   ;;  %v411_v27 = vcombine.high %v26_v25, %v26_v25  ;;  %v410_v28 = vcombine.low %v26_v25, %v26_v25 }
   0xa   :  { %v434_v41 = vld [vmem:[%s671_s2] ss:$0 sm:$0xff] }
   0xb   :  { %451 = vmatpush3.bf16.msra.mxu0 %v508_v6  ;;  %490 = vmatmul.mubr.msk.bf16.vlgmr.msra.gmra.mxu1 %vm212_vm1, %v521_v15  ;;  %v435_v45 = vld [vmem:[%s672_s3] ss:$0 sm:$0xff] }
   0xc   :  { %452 = vmatprep.subr.bf16.mxu0 %v509_v7  ;;  %493 = vmatprep.mubr.msk.bf16.mxu1 %vm533_vm0, %v532_v1 }
   0xf   :  { %453 = vmatpush3.bf16.msra.mxu0 %v510_v8 }
  0x10   :  { %454 = vmatprep.subr.bf16.mxu0 %v511_v9 }
  0x13   :  { %455 = vmatpush3.bf16.msra.mxu0 %v512_v11  ;;  %494 = vmatmul.mubr.msk.bf16.gmra.mxu1 %vm212_vm1, %v525_v20 }
  0x14   :  { %456 = vmatprep.subr.bf16.mxu0 %v513_v13  ;;  %497 = vmatprep.mubr.msk.bf16.mxu1 %vm533_vm0, %v532_v1 }
  0x17   :  { %457 = vmatpush3.bf16.msra.mxu0 %v514_v14 }
  0x18   :  { %458 = vmatprep.subr.bf16.mxu0 %v516_v16 }
  0x1b   :  { %459 = vmatpush3.bf16.msra.mxu0 %v517_v18  ;;  %498 = vmatmul.mubr.msk.bf16.gmra.mxu1 %vm212_vm1, %v529_v24 }
  0x1c   :  { %460 = vmatprep.subr.bf16.mxu0 %v519_v19 }
  0x1f   :  { %461 = vmatpush3.bf16.msra.mxu0 %v520_v21 }
  0x22   :  { %255 = vmatmul.mubr.bf16.vlgmr.msra.gmra.mxu0 %v522_v22 }
  0x23   :  { %262 = vmatprep.mubr.bf16.mxu0 %v526_v23 }
  0x2a   :  { %263 = vmatmul.mubr.bf16.gmra.mxu0 %v528_v26 }
  0x2b   :  { %270 = vmatprep.mubr.bf16.mxu0 %v411_v27 }
  0x32   :  { %271 = vmatmul.mubr.bf16.gmra.mxu0 %v410_v28 }
  0xcb   :  { %v312_v29 = vpop.f32.mrf.mxu1 }
  0xcd   :  { %v491_v30 = vpop.f32.mrf.mxu1 }
  0xcf   :  { %v315_v31 = vpop.f32.mrf.mxu1 }
  0xd1   :  { %v492_v32 = vpop.f32.mrf.mxu1 }
  0xd3   :  { %v320_v33 = vpop.f32.mrf.mxu1 }
  0xd5   :  { %v495_v34 = vpop.f32.mrf.mxu1 }
  0xd7   :  { %v323_v35 = vpop.f32.mrf.mxu1 }
  0xd9   :  { %v496_v37 = vpop.f32.mrf.mxu1 }
  0xdb   :  { %v328_v40 = vpop.f32.mrf.mxu1 }
  0xdd   :  { %v499_v44 = vpop.f32.mrf.mxu1 }
  0xdf   :  { %v331_v49 = vpop.f32.mrf.mxu1 }
  0xe1   :  { %v500_v53 = vpop.f32.mrf.mxu1 }
  0xe2   :  { %v462_v36 = vpop.f32.mrf.mxu0 }
  0xe4   :  { %v463_v38 = vpop.f32.mrf.mxu0 }
  0xe5   :  { %v464_v39 = vadd.f32 %v463_v38, %v462_v36 }
  0xe6   :  { %v465_v42 = vpop.f32.mrf.mxu0 }
  0xe7   :  { %v313_v43 = vadd.f32 %v464_v39, %v312_v29 }
  0xe8   :  { %v466_v46 = vpop.f32.mrf.mxu0 }
  0xe9   :  { %v341_v47 = vmul.f32 %v434_v41, %v313_v43  ;;  %v467_v48 = vadd.f32 %v466_v46, %v465_v42 }
  0xea   :  { %v468_v50 = vpop.f32.mrf.mxu0 }
  0xeb   :  { %v353_v51 = vadd.f32 %v435_v45, %v341_v47  ;;  %v316_v52 = vadd.f32 %v467_v48, %v315_v31 }
  0xec   :  { %v469_v54 = vpop.f32.mrf.mxu0 }
  0xed   :  { %vm358_vm2 = vcmp.ge.f32.partialorder %v353_v51, 0.0  ;;  %v363_v55 = vmul.f32 0.2, %v353_v51  ;;  %v342_v56 = vmul.f32 %v434_v41, %v316_v52  ;;  %v470_v57 = vadd.f32 %v469_v54, %v468_v50 }
  0xee   :  { %v471_v58 = vpop.f32.mrf.mxu0 }
  0xef   :  { %v368_v59 = vsel %vm358_vm2, %v353_v51, %v363_v55  ;;  %v354_v60 = vadd.f32 %v435_v45, %v342_v56  ;;  %v321_v61 = vadd.f32 %v470_v57, %v320_v33 }
  0xf0   :  { %v441_v62 = vpack.c.bf16 %v368_v59, %v368_v59  ;;  %v472_v63 = vpop.f32.mrf.mxu0 }
  0xf1   :  { %vm359_vm4 = vcmp.ge.f32.partialorder %v354_v60, 0.0  ;;  %v364_v0 = vmul.f32 0.2, %v354_v60  ;;  %v343_v1 = vmul.f32 %v434_v41, %v321_v61  ;;  %v473_v2 = vadd.f32 %v472_v63, %v471_v58 }
  0xf2   :  { %395 = vst.msk [vmem:[%s673_s4] sm:$0xf] %vm394_vm3, %v441_v62  ;;  %v474_v3 = vpop.f32.mrf.mxu0 }
  0xf3   :  { %v369_v4 = vsel %vm359_vm4, %v354_v60, %v364_v0  ;;  %v355_v5 = vadd.f32 %v435_v45, %v343_v1  ;;  %v324_v6 = vadd.f32 %v473_v2, %v323_v35 }
  0xf4   :  { %v442_v7 = vpack.c.bf16 %v369_v4, %v369_v4  ;;  %v475_v8 = vpop.f32.mrf.mxu0 }
  0xf5   :  { %vm360_vm5 = vcmp.ge.f32.partialorder %v355_v5, 0.0  ;;  %v365_v9 = vmul.f32 0.2, %v355_v5  ;;  %v344_v10 = vmul.f32 %v434_v41, %v324_v6  ;;  %v476_v11 = vadd.f32 %v475_v8, %v474_v3 }
  0xf6   :  { %396 = vst.msk [vmem:[%s673_s4 + $0x4] sm:$0xf] %vm394_vm3, %v442_v7  ;;  %v477_v12 = vpop.f32.mrf.mxu0 }
  0xf7   :  { %v370_v13 = vsel %vm360_vm5, %v355_v5, %v365_v9  ;;  %v356_v14 = vadd.f32 %v435_v45, %v344_v10  ;;  %v329_v15 = vadd.f32 %v476_v11, %v328_v40 }
  0xf8   :  { %v443_v16 = vpack.c.bf16 %v370_v13, %v370_v13  ;;  %v478_v17 = vpop.f32.mrf.mxu0 }
  0xf9   :  { %vm361_vm6 = vcmp.ge.f32.partialorder %v356_v14, 0.0  ;;  %v366_v18 = vmul.f32 0.2, %v356_v14  ;;  %v345_v19 = vmul.f32 %v434_v41, %v329_v15 }
  0xfa   :  { %397 = vst.msk [vmem:[%s673_s4 + $0x8] sm:$0xf] %vm394_vm3, %v443_v16 }
  0xfb   :  { %v371_v20 = vsel %vm361_vm6, %v356_v14, %v366_v18  ;;  %v357_v21 = vadd.f32 %v435_v45, %v345_v19 }
  0xfc   :  { %v444_v22 = vpack.c.bf16 %v371_v20, %v371_v20 }
  0xfd   :  { %vm362_vm7 = vcmp.ge.f32.partialorder %v357_v21, 0.0  ;;  %v367_v23 = vmul.f32 0.2, %v357_v21 }
  0xfe   :  { %398 = vst.msk [vmem:[%s673_s4 + $0xc] sm:$0xf] %vm394_vm3, %v444_v22 }
  0xff   :  { %v372_v24 = vsel %vm362_vm7, %v357_v21, %v367_v23 }
 0x100   :  { %v445_v25 = vpack.c.bf16 %v372_v24, %v372_v24 }
 0x102   :  { %399 = vst.msk [vmem:[%s673_s4 + $0x10] sm:$0xf] %vm394_vm3, %v445_v25 }

// kernel: discriminator3d_forward.7
= control target key start
LH: loop header
LB: loop body
LE: loop exit
PB: predicated region body
PF: predicated region fallthrough
CT: control target
= control target key end

     0   :  { %v309_v0 = vmov 0   ;;  %vm132_vm0 = vcmask 523264   ;;  %s416_s1 = inlined_call_operand.vmem [shape: bf16[192,128], index: 1, kind: input, shape index: {}]   ;;  %s417_s0 = inlined_call_operand.vmem [shape: bf16[24,192], index: 0, kind: input, shape index: {}]   ;;  %s418_s2 = inlined_call_operand.vmem [shape: f32[1,128], index: 2, kind: input, shape index: {}]   ;;  %s419_s3 = inlined_call_operand.vmem [shape: f32[1,128], index: 3, kind: input, shape index: {}]   ;;  %s420_s4 = inlined_call_operand.vmem [shape: bf16[24,128], index: 4, kind: output, shape index: {}]  }
   0x1   :  { %139 = vmatprep.subr.bf16.mxu0 %v309_v0  ;;  %267 = vmatprep.subr.bf16.mxu1 %v309_v0  ;;  %v292_v1 = vld [vmem:[%s416_s1 + $0x38] sm:$0xff]   ;;  %v293_v2 = vld [vmem:[%s416_s1 + $0x30] sm:$0xff]   ;;  %v294_v3 = vld [vmem:[%s416_s1 + $0x28] sm:$0xff]  }
   0x2   :  { %140 = vmatpush1.bf16.msra.mxu0 %v292_v1  ;;  %279 = vmatpush1.bf16.msra.mxu1 %v292_v1  ;;  %v295_v4 = vld [vmem:[%s416_s1 + $0x20] sm:$0xff]   ;;  %v20_v6 = vld [vmem:[%s417_s0 + $0x10] sm:$0xff]  ;;  %v296_v7 = vld [vmem:[%s416_s1 + $0x18] sm:$0xff]  }
   0x3   :  { %141 = vmatprep.subr.bf16.mxu0 %v309_v0  ;;  %268 = vmatprep.subr.bf16.mxu1 %v309_v0  ;;  %v306_v5 = vld [vmem:[%s417_s0 + $0x4] ss:$8 sps:$4 sm:$0xff]   ;;  %v239_v8 = vcombine.high %v20_v6, %v20_v6  ;;  %v297_v9 = vld [vmem:[%s416_s1 + $0x10] sm:$0xff]   ;;  %v300_v12 = vld [vmem:[%s416_s1 + $0x58] sm:$0xff]   ;;  %v238_v17 = vcombine.low %v20_v6, %v20_v6 }
   0x4   :  { %252 = vmatprep.mubr.msk.bf16.mxu0 %vm132_vm0, %v306_v5  ;;  %v298_v10 = vld [vmem:[%s416_s1 + $0x8] sm:$0xff]   ;;  %v299_v11 = vld [vmem:[%s416_s1] sm:$0xff]   ;;  %v301_v13 = vld [vmem:[%s416_s1 + $0x50] sm:$0xff]  }
   0x5   :  { %253 = vmatprep.mubr.msk.bf16.mxu1 %vm132_vm0, %v239_v8  ;;  %v302_v14 = vld [vmem:[%s416_s1 + $0x48] sm:$0xff]   ;;  %v303_v15 = vld [vmem:[%s416_s1 + $0x40] sm:$0xff]  }
   0x6   :  { %142 = vmatpush1.bf16.msra.mxu0 %v293_v2  ;;  %280 = vmatpush1.bf16.msra.mxu1 %v293_v2  ;;  %v304_v16 = vld [vmem:[%s417_s0] ss:$8 sps:$4 sm:$0xff]  }
   0x7   :  { %143 = vmatprep.subr.bf16.mxu0 %v309_v0  ;;  %269 = vmatprep.subr.bf16.mxu1 %v309_v0  ;;  %v254_v18 = vld [vmem:[%s418_s2] ss:$0 sm:$0xff] }
   0x8   :  { %v255_v22 = vld [vmem:[%s419_s3] ss:$0 sm:$0xff] }
   0xa   :  { %144 = vmatpush1.bf16.msra.mxu0 %v294_v3  ;;  %281 = vmatpush1.bf16.msra.mxu1 %v294_v3 }
   0xb   :  { %145 = vmatprep.subr.bf16.mxu0 %v309_v0  ;;  %270 = vmatprep.subr.bf16.mxu1 %v309_v0 }
   0xe   :  { %146 = vmatpush1.bf16.msra.mxu0 %v295_v4  ;;  %282 = vmatpush1.bf16.msra.mxu1 %v295_v4 }
   0xf   :  { %147 = vmatprep.subr.bf16.mxu0 %v309_v0  ;;  %271 = vmatprep.subr.bf16.mxu1 %v309_v0 }
  0x12   :  { %148 = vmatpush1.bf16.msra.mxu0 %v296_v7  ;;  %283 = vmatpush1.bf16.msra.mxu1 %v296_v7 }
  0x13   :  { %149 = vmatprep.subr.bf16.mxu0 %v309_v0  ;;  %272 = vmatprep.subr.bf16.mxu1 %v309_v0 }
  0x16   :  { %150 = vmatpush1.bf16.msra.mxu0 %v297_v9  ;;  %284 = vmatpush1.bf16.msra.mxu1 %v297_v9 }
  0x17   :  { %151 = vmatprep.subr.bf16.mxu0 %v309_v0  ;;  %273 = vmatprep.subr.bf16.mxu1 %v309_v0 }
  0x1a   :  { %152 = vmatpush1.bf16.msra.mxu0 %v298_v10  ;;  %285 = vmatpush1.bf16.msra.mxu1 %v298_v10 }
  0x1b   :  { %153 = vmatprep.subr.bf16.mxu0 %v309_v0  ;;  %274 = vmatprep.subr.bf16.mxu1 %v309_v0 }
  0x1e   :  { %154 = vmatpush1.bf16.msra.mxu0 %v299_v11  ;;  %286 = vmatpush1.bf16.msra.mxu1 %v299_v11 }
  0x1f   :  { %163 = vmatprep.subr.bf16.mxu0 %v309_v0  ;;  %275 = vmatprep.subr.bf16.mxu1 %v309_v0 }
  0x22   :  { %164 = vmatpush2.bf16.msra.mxu0 %v300_v12  ;;  %287 = vmatpush2.bf16.msra.mxu1 %v300_v12 }
  0x23   :  { %165 = vmatprep.subr.bf16.mxu0 %v309_v0  ;;  %276 = vmatprep.subr.bf16.mxu1 %v309_v0 }
  0x26   :  { %166 = vmatpush2.bf16.msra.mxu0 %v301_v13  ;;  %288 = vmatpush2.bf16.msra.mxu1 %v301_v13 }
  0x27   :  { %167 = vmatprep.subr.bf16.mxu0 %v309_v0  ;;  %277 = vmatprep.subr.bf16.mxu1 %v309_v0 }
  0x2a   :  { %168 = vmatpush2.bf16.msra.mxu0 %v302_v14  ;;  %289 = vmatpush2.bf16.msra.mxu1 %v302_v14 }
  0x2b   :  { %169 = vmatprep.subr.bf16.mxu0 %v309_v0  ;;  %278 = vmatprep.subr.bf16.mxu1 %v309_v0 }
  0x2e   :  { %170 = vmatpush2.bf16.msra.mxu0 %v303_v15  ;;  %290 = vmatpush2.bf16.msra.mxu1 %v303_v15 }
  0x31   :  { %172 = vmatmul.mubr.bf16.vlgmr.msra.gmra.mxu0 %v304_v16  ;;  %180 = vmatmul.mubr.bf16.vlgmr.msra.gmra.mxu1 %v238_v17 }
  0xf1   :  { %v173_v19 = vpop.f32.mrf.mxu0  ;;  %v181_v20 = vpop.f32.mrf.mxu1 }
  0xf2   :  { %v194_v21 = vmul.f32 %v254_v18, %v173_v19  ;;  %v196_v23 = vmul.f32 %v254_v18, %v181_v20 }
  0xf3   :  { %v175_v24 = vpop.f32.mrf.mxu0  ;;  %v183_v25 = vpop.f32.mrf.mxu1 }
  0xf4   :  { %v206_v26 = vadd.f32 %v255_v22, %v196_v23  ;;  %v204_v27 = vadd.f32 %v255_v22, %v194_v21 }
  0xf5   :  { %v176_v28 = vpop.f32.mrf.mxu0  ;;  %v184_v29 = vpop.f32.mrf.mxu1 }
  0xf6   :  { %vm209_vm1 = vcmp.ge.f32.partialorder %v206_v26, 0.0  ;;  %v212_v30 = vmul.f32 0.2, %v206_v26  ;;  %v195_v31 = vmul.f32 %v254_v18, %v176_v28  ;;  %v210_v35 = vmul.f32 0.2, %v204_v27 }
  0xf7   :  { %v178_v32 = vpop.f32.mrf.mxu0  ;;  %v185_v33 = vpop.f32.mrf.mxu1  ;;  %vm207_vm2 = vcmp.ge.f32.partialorder %v204_v27, 0.0 }
  0xf8   :  { %v215_v34 = vsel %vm209_vm1, %v206_v26, %v212_v30  ;;  %v205_v37 = vadd.f32 %v255_v22, %v195_v31  ;;  %v213_v39 = vsel %vm207_vm2, %v204_v27, %v210_v35 }
  0xf9   :  { %v261_v36 = vpack.c.bf16 %v215_v34, %v215_v34 }
  0xfa   :  { %vm208_vm3 = vcmp.ge.f32.partialorder %v205_v37, 0.0  ;;  %v211_v38 = vmul.f32 0.2, %v205_v37 }
  0xfb   :  { %231 = vst [vmem:[%s420_s4 + $0x8] sm:$0xf] %v261_v36 }
  0xfc   :  { %v214_v40 = vsel %vm208_vm3, %v205_v37, %v211_v38 }
  0xfd   :  { %v265_v41 = vpack.c.bf16 %v214_v40, %v213_v39 }
  0xff   :  { %266 = vst [vmem:[%s420_s4] sm:$0xff] %v265_v41  }

// kernel: discriminator3d_forward.8
= control target key start
LH: loop header
LB: loop body
LE: loop exit
PB: predicated region body
PF: predicated region fallthrough
CT: control target
= control target key end

     0   :  { %s2046_s1 = inlined_call_operand.vmem [shape: bf16[1152,256], index: 1, kind: input, shape index: {}]   ;;  %s2047_s0 = inlined_call_operand.vmem [shape: bf16[8,1152], index: 0, kind: input, shape index: {}]   ;;  %s2048_s2 = inlined_call_operand.vmem [shape: f32[1,256], index: 2, kind: input, shape index: {}]   ;;  %s2049_s3 = inlined_call_operand.vmem [shape: f32[1,256], index: 3, kind: input, shape index: {}]   ;;  %s2050_s4 = inlined_call_operand.vmem [shape: bf16[8,256], index: 4, kind: output, shape index: {}]  }
   0x1   :  { %v1327_v0 = vld [vmem:[%s2046_s1 + $0x74] ss:$8 sps:$4 sm:$0xff]   ;;  %v1331_v2 = vld [vmem:[%s2046_s1 + $0x70] ss:$8 sps:$4 sm:$0xff]   ;;  %v1333_v4 = vld [vmem:[%s2046_s1 + $0x64] ss:$8 sps:$4 sm:$0xff]  }
   0x2   :  { %v1329_v1 = vld [vmem:[%s2046_s1 + $0x174] ss:$8 sps:$4 sm:$0xff]   ;;  %919 = vmatprep.subr.bf16.mxu0 %v1327_v0  ;;  %v1332_v3 = vld [vmem:[%s2046_s1 + $0x170] ss:$8 sps:$4 sm:$0xff]   ;;  %v1335_v5 = vld [vmem:[%s2046_s1 + $0x164] ss:$8 sps:$4 sm:$0xff]  }
   0x3   :  { %960 = vmatprep.subr.bf16.mxu1 %v1329_v1  ;;  %920 = vmatpush1.bf16.msra.mxu0 %v1331_v2  ;;  %v1337_v6 = vld [vmem:[%s2046_s1 + $0x60] ss:$8 sps:$4 sm:$0xff]   ;;  %v1339_v8 = vld [vmem:[%s2046_s1 + $0x54] ss:$8 sps:$4 sm:$0xff]   ;;  %v1343_v10 = vld [vmem:[%s2046_s1 + $0x50] ss:$8 sps:$4 sm:$0xff]  }
   0x4   :  { %961 = vmatpush1.bf16.msra.mxu1 %v1332_v3  ;;  %921 = vmatprep.subr.bf16.mxu0 %v1333_v4  ;;  %v1338_v7 = vld [vmem:[%s2046_s1 + $0x160] ss:$8 sps:$4 sm:$0xff]   ;;  %v1341_v9 = vld [vmem:[%s2046_s1 + $0x154] ss:$8 sps:$4 sm:$0xff]   ;;  %v1344_v11 = vld [vmem:[%s2046_s1 + $0x150] ss:$8 sps:$4 sm:$0xff]  }
   0x5   :  { %962 = vmatprep.subr.bf16.mxu1 %v1335_v5  ;;  %v1345_v12 = vld [vmem:[%s2046_s1 + $0x44] ss:$8 sps:$4 sm:$0xff]   ;;  %v1349_v14 = vld [vmem:[%s2046_s1 + $0x40] ss:$8 sps:$4 sm:$0xff]   ;;  %v1351_v16 = vld [vmem:[%s2046_s1 + $0x34] ss:$8 sps:$4 sm:$0xff]  }
   0x6   :  { %v1347_v13 = vld [vmem:[%s2046_s1 + $0x144] ss:$8 sps:$4 sm:$0xff]   ;;  %v1350_v15 = vld [vmem:[%s2046_s1 + $0x140] ss:$8 sps:$4 sm:$0xff]   ;;  %v1353_v17 = vld [vmem:[%s2046_s1 + $0x134] ss:$8 sps:$4 sm:$0xff]  }
   0x7   :  { %922 = vmatpush1.bf16.msra.mxu0 %v1337_v6  ;;  %v1355_v18 = vld [vmem:[%s2046_s1 + $0x30] ss:$8 sps:$4 sm:$0xff]   ;;  %v1357_v20 = vld [vmem:[%s2046_s1 + $0x24] ss:$8 sps:$4 sm:$0xff]   ;;  %v1361_v22 = vld [vmem:[%s2046_s1 + $0x20] ss:$8 sps:$4 sm:$0xff]  }
   0x8   :  { %963 = vmatpush1.bf16.msra.mxu1 %v1338_v7  ;;  %923 = vmatprep.subr.bf16.mxu0 %v1339_v8  ;;  %v1356_v19 = vld [vmem:[%s2046_s1 + $0x130] ss:$8 sps:$4 sm:$0xff]   ;;  %v1359_v21 = vld [vmem:[%s2046_s1 + $0x124] ss:$8 sps:$4 sm:$0xff]   ;;  %v1362_v23 = vld [vmem:[%s2046_s1 + $0x120] ss:$8 sps:$4 sm:$0xff]  }
   0x9   :  { %964 = vmatprep.subr.bf16.mxu1 %v1341_v9  ;;  %v1363_v24 = vld [vmem:[%s2046_s1 + $0x14] ss:$8 sps:$4 sm:$0xff]   ;;  %v1367_v26 = vld [vmem:[%s2046_s1 + $0x10] ss:$8 sps:$4 sm:$0xff]   ;;  %v1369_v28 = vld [vmem:[%s2046_s1 + $0x4] ss:$8 sps:$4 sm:$0xff]  }
   0xa   :  { %v1365_v25 = vld [vmem:[%s2046_s1 + $0x114] ss:$8 sps:$4 sm:$0xff]   ;;  %v1368_v27 = vld [vmem:[%s2046_s1 + $0x110] ss:$8 sps:$4 sm:$0xff]   ;;  %v1371_v29 = vld [vmem:[%s2046_s1 + $0x104] ss:$8 sps:$4 sm:$0xff]  }
   0xb   :  { %924 = vmatpush1.bf16.msra.mxu0 %v1343_v10  ;;  %v1373_v30 = vld [vmem:[%s2046_s1] ss:$8 sps:$4 sm:$0xff]   ;;  %v1375_v32 = vld [vmem:[%s2046_s1 + $0xf4] ss:$8 sps:$4 sm:$0xff]   ;;  %v1379_v34 = vld [vmem:[%s2046_s1 + $0xf0] ss:$8 sps:$4 sm:$0xff]  }
   0xc   :  { %965 = vmatpush1.bf16.msra.mxu1 %v1344_v11  ;;  %925 = vmatprep.subr.bf16.mxu0 %v1345_v12  ;;  %v1374_v31 = vld [vmem:[%s2046_s1 + $0x100] ss:$8 sps:$4 sm:$0xff]   ;;  %v1377_v33 = vld [vmem:[%s2046_s1 + $0x1f4] ss:$8 sps:$4 sm:$0xff]   ;;  %v1380_v35 = vld [vmem:[%s2046_s1 + $0x1f0] ss:$8 sps:$4 sm:$0xff]  }
   0xd   :  { %966 = vmatprep.subr.bf16.mxu1 %v1347_v13  ;;  %v1381_v36 = vld [vmem:[%s2046_s1 + $0xe4] ss:$8 sps:$4 sm:$0xff]   ;;  %v1385_v38 = vld [vmem:[%s2046_s1 + $0xe0] ss:$8 sps:$4 sm:$0xff]   ;;  %v1387_v40 = vld [vmem:[%s2046_s1 + $0xd4] ss:$8 sps:$4 sm:$0xff]  }
   0xe   :  { %v1383_v37 = vld [vmem:[%s2046_s1 + $0x1e4] ss:$8 sps:$4 sm:$0xff]   ;;  %v1386_v39 = vld [vmem:[%s2046_s1 + $0x1e0] ss:$8 sps:$4 sm:$0xff]   ;;  %v1389_v41 = vld [vmem:[%s2046_s1 + $0x1d4] ss:$8 sps:$4 sm:$0xff]  }
   0xf   :  { %926 = vmatpush1.bf16.msra.mxu0 %v1349_v14  ;;  %v1391_v42 = vld [vmem:[%s2046_s1 + $0xd0] ss:$8 sps:$4 sm:$0xff]   ;;  %v1393_v44 = vld [vmem:[%s2046_s1 + $0xc4] ss:$8 sps:$4 sm:$0xff]   ;;  %v1397_v49 = vld [vmem:[%s2046_s1 + $0xc0] ss:$8 sps:$4 sm:$0xff]  }
  0x10   :  { %967 = vmatpush1.bf16.msra.mxu1 %v1350_v15  ;;  %927 = vmatprep.subr.bf16.mxu0 %v1351_v16  ;;  %v1392_v43 = vld [vmem:[%s2046_s1 + $0x1d0] ss:$8 sps:$4 sm:$0xff]   ;;  %v1395_v45 = vld [vmem:[%s2046_s1 + $0x1c4] ss:$8 sps:$4 sm:$0xff]   ;;  %v1398_v50 = vld [vmem:[%s2046_s1 + $0x1c0] ss:$8 sps:$4 sm:$0xff]  }
  0x11   :  { %968 = vmatprep.subr.bf16.mxu1 %v1353_v17  ;;  %v18_v46 = vld [vmem:[%s2047_s0] sm:$0xff]  ;;  %v19_v48 = vld [vmem:[%s2047_s0 + $0x8] sm:$0xff]  ;;  %v1399_v52 = vld [vmem:[%s2046_s1 + $0xb4] ss:$8 sps:$4 sm:$0xff]  }
  0x12   :  { %v1172_v47 = vcombine.high %v18_v46, %v18_v46  ;;  %v1174_v51 = vcombine.high %v19_v48, %v19_v48  ;;  %v1401_v53 = vld [vmem:[%s2046_s1 + $0x1b4] ss:$8 sps:$4 sm:$0xff]   ;;  %v1403_v54 = vld [vmem:[%s2046_s1 + $0xb0] ss:$8 sps:$4 sm:$0xff]   ;;  %v1405_v56 = vld [vmem:[%s2046_s1 + $0xa4] ss:$8 sps:$4 sm:$0xff]   ;;  %v1171_v6 = vcombine.low %v18_v46, %v18_v46  ;;  %v1173_v7 = vcombine.low %v19_v48, %v19_v48 }
  0x13   :  { %928 = vmatpush1.bf16.msra.mxu0 %v1355_v18  ;;  %v1404_v55 = vld [vmem:[%s2046_s1 + $0x1b0] ss:$8 sps:$4 sm:$0xff]   ;;  %v1407_v57 = vld [vmem:[%s2046_s1 + $0x1a4] ss:$8 sps:$4 sm:$0xff]   ;;  %v1409_v58 = vld [vmem:[%s2046_s1 + $0xa0] ss:$8 sps:$4 sm:$0xff]  }
  0x14   :  { %969 = vmatpush1.bf16.msra.mxu1 %v1356_v19  ;;  %929 = vmatprep.subr.bf16.mxu0 %v1357_v20  ;;  %v1410_v59 = vld [vmem:[%s2046_s1 + $0x1a0] ss:$8 sps:$4 sm:$0xff]   ;;  %v1411_v60 = vld [vmem:[%s2046_s1 + $0x94] ss:$8 sps:$4 sm:$0xff]   ;;  %v1415_v62 = vld [vmem:[%s2046_s1 + $0x90] ss:$8 sps:$4 sm:$0xff]  }
  0x15   :  { %970 = vmatprep.subr.bf16.mxu1 %v1359_v21  ;;  %951 = vmatprep.mubr.bf16.mxu0 %v1172_v47  ;;  %v1413_v61 = vld [vmem:[%s2046_s1 + $0x194] ss:$8 sps:$4 sm:$0xff]   ;;  %v1416_v63 = vld [vmem:[%s2046_s1 + $0x190] ss:$8 sps:$4 sm:$0xff]   ;;  %v1417_v0 = vld [vmem:[%s2046_s1 + $0x84] ss:$8 sps:$4 sm:$0xff]  }
  0x16   :  { %992 = vmatprep.mubr.bf16.mxu1 %v1174_v51  ;;  %v1419_v1 = vld [vmem:[%s2046_s1 + $0x184] ss:$8 sps:$4 sm:$0xff]   ;;  %v1421_v2 = vld [vmem:[%s2046_s1 + $0x80] ss:$8 sps:$4 sm:$0xff]   ;;  %v1429_v4 = vld [vmem:[%s2046_s1 + $0x274] ss:$8 sps:$4 sm:$0xff]  }
  0x17   :  { %930 = vmatpush1.bf16.msra.mxu0 %v1361_v22  ;;  %v1422_v3 = vld [vmem:[%s2046_s1 + $0x180] ss:$8 sps:$4 sm:$0xff]   ;;  %v1432_v5 = vld [vmem:[%s2046_s1 + $0x374] ss:$8 sps:$4 sm:$0xff]   ;;  %v1427_v8 = vld [vmem:[%s2046_s1 + $0x270] ss:$8 sps:$4 sm:$0xff]  }
  0x18   :  { %971 = vmatpush1.bf16.msra.mxu1 %v1362_v23  ;;  %931 = vmatprep.subr.bf16.mxu0 %v1363_v24  ;;  %v1430_v9 = vld [vmem:[%s2046_s1 + $0x370] ss:$8 sps:$4 sm:$0xff]   ;;  %v1435_v10 = vld [vmem:[%s2046_s1 + $0x264] ss:$8 sps:$4 sm:$0xff]   ;;  %v1433_v12 = vld [vmem:[%s2046_s1 + $0x260] ss:$8 sps:$4 sm:$0xff]  }
  0x19   :  { %972 = vmatprep.subr.bf16.mxu1 %v1365_v25  ;;  %v1438_v11 = vld [vmem:[%s2046_s1 + $0x364] ss:$8 sps:$4 sm:$0xff]   ;;  %v1436_v13 = vld [vmem:[%s2046_s1 + $0x360] ss:$8 sps:$4 sm:$0xff]   ;;  %v1441_v14 = vld [vmem:[%s2046_s1 + $0x254] ss:$8 sps:$4 sm:$0xff]  }
  0x1a   :  { %v1444_v15 = vld [vmem:[%s2046_s1 + $0x354] ss:$8 sps:$4 sm:$0xff]   ;;  %v1439_v16 = vld [vmem:[%s2046_s1 + $0x250] ss:$8 sps:$4 sm:$0xff]   ;;  %v1447_v18 = vld [vmem:[%s2046_s1 + $0x244] ss:$8 sps:$4 sm:$0xff]  }
  0x1b   :  { %932 = vmatpush1.bf16.msra.mxu0 %v1367_v26  ;;  %v1442_v17 = vld [vmem:[%s2046_s1 + $0x350] ss:$8 sps:$4 sm:$0xff]   ;;  %v1450_v19 = vld [vmem:[%s2046_s1 + $0x344] ss:$8 sps:$4 sm:$0xff]   ;;  %v1445_v20 = vld [vmem:[%s2046_s1 + $0x240] ss:$8 sps:$4 sm:$0xff]  }
  0x1c   :  { %973 = vmatpush1.bf16.msra.mxu1 %v1368_v27  ;;  %933 = vmatprep.subr.bf16.mxu0 %v1369_v28  ;;  %v1448_v21 = vld [vmem:[%s2046_s1 + $0x340] ss:$8 sps:$4 sm:$0xff]   ;;  %v1453_v22 = vld [vmem:[%s2046_s1 + $0x234] ss:$8 sps:$4 sm:$0xff]   ;;  %v1451_v24 = vld [vmem:[%s2046_s1 + $0x230] ss:$8 sps:$4 sm:$0xff]  }
  0x1d   :  { %974 = vmatprep.subr.bf16.mxu1 %v1371_v29  ;;  %v1456_v23 = vld [vmem:[%s2046_s1 + $0x334] ss:$8 sps:$4 sm:$0xff]   ;;  %v1454_v25 = vld [vmem:[%s2046_s1 + $0x330] ss:$8 sps:$4 sm:$0xff]   ;;  %v1459_v26 = vld [vmem:[%s2046_s1 + $0x224] ss:$8 sps:$4 sm:$0xff]  }
  0x1e   :  { %v1462_v27 = vld [vmem:[%s2046_s1 + $0x324] ss:$8 sps:$4 sm:$0xff]   ;;  %v1457_v28 = vld [vmem:[%s2046_s1 + $0x220] ss:$8 sps:$4 sm:$0xff]   ;;  %v1492_v51 = vld [vmem:[%s2046_s1 + $0x3d4] ss:$8 sps:$4 sm:$0xff]  }
  0x1f   :  { %934 = vmatpush1.bf16.msra.mxu0 %v1373_v30  ;;  %v1460_v29 = vld [vmem:[%s2046_s1 + $0x320] ss:$8 sps:$4 sm:$0xff]   ;;  %v1465_v30 = vld [vmem:[%s2046_s1 + $0x214] ss:$8 sps:$4 sm:$0xff]   ;;  %v1483_v46 = vld [vmem:[%s2046_s1 + $0x2e4] ss:$8 sps:$4 sm:$0xff]  }
  0x20   :  { %975 = vmatpush1.bf16.msra.mxu1 %v1374_v31  ;;  %935 = vmatprep.subr.bf16.mxu0 %v1375_v32  ;;  %v1468_v31 = vld [vmem:[%s2046_s1 + $0x314] ss:$8 sps:$4 sm:$0xff]   ;;  %v1486_v47 = vld [vmem:[%s2046_s1 + $0x3e4] ss:$8 sps:$4 sm:$0xff]   ;;  %v1481_v48 = vld [vmem:[%s2046_s1 + $0x2e0] ss:$8 sps:$4 sm:$0xff]  }
  0x21   :  { %976 = vmatprep.subr.bf16.mxu1 %v1377_v33  ;;  %v1857_v32 = vld [vmem:[%s2047_s0 + $0x10] sm:$0xff] }
  0x22   :  { %v1463_v33 = vld [vmem:[%s2046_s1 + $0x210] ss:$8 sps:$4 sm:$0xff]  }
  0x23   :  { %936 = vmatpush2.bf16.msra.mxu0 %v1379_v34  ;;  %v1466_v34 = vld [vmem:[%s2046_s1 + $0x310] ss:$8 sps:$4 sm:$0xff]  }
  0x24   :  { %977 = vmatpush2.bf16.msra.mxu1 %v1380_v35  ;;  %937 = vmatprep.subr.bf16.mxu0 %v1381_v36  ;;  %v1176_v35 = vcombine.high %v1857_v32, %v1857_v32  ;;  %v1870_v36 = vld [vmem:[%s2047_s0 + $0x18] sm:$0xff] }
  0x25   :  { %978 = vmatprep.subr.bf16.mxu1 %v1383_v37  ;;  %v1471_v37 = vld [vmem:[%s2046_s1 + $0x204] ss:$8 sps:$4 sm:$0xff]  }
  0x27   :  { %938 = vmatpush2.bf16.msra.mxu0 %v1385_v38  ;;  %v1178_v38 = vcombine.high %v1870_v36, %v1870_v36 }
  0x28   :  { %979 = vmatpush2.bf16.msra.mxu1 %v1386_v39  ;;  %939 = vmatprep.subr.bf16.mxu0 %v1387_v40  ;;  %v1474_v39 = vld [vmem:[%s2046_s1 + $0x304] ss:$8 sps:$4 sm:$0xff]   ;;  %v1469_v40 = vld [vmem:[%s2046_s1 + $0x200] ss:$8 sps:$4 sm:$0xff]  }
  0x29   :  { %980 = vmatprep.subr.bf16.mxu1 %v1389_v41  ;;  %v1472_v41 = vld [vmem:[%s2046_s1 + $0x300] ss:$8 sps:$4 sm:$0xff]  }
  0x2b   :  { %940 = vmatpush2.bf16.msra.mxu0 %v1391_v42  ;;  %v1477_v42 = vld [vmem:[%s2046_s1 + $0x2f4] ss:$8 sps:$4 sm:$0xff]  }
  0x2c   :  { %981 = vmatpush2.bf16.msra.mxu1 %v1392_v43  ;;  %941 = vmatprep.subr.bf16.mxu0 %v1393_v44  ;;  %v1480_v43 = vld [vmem:[%s2046_s1 + $0x3f4] ss:$8 sps:$4 sm:$0xff]   ;;  %v1475_v44 = vld [vmem:[%s2046_s1 + $0x2f0] ss:$8 sps:$4 sm:$0xff]  }
  0x2d   :  { %982 = vmatprep.subr.bf16.mxu1 %v1395_v45  ;;  %v1478_v45 = vld [vmem:[%s2046_s1 + $0x3f0] ss:$8 sps:$4 sm:$0xff]  }
  0x2f   :  { %942 = vmatpush2.bf16.msra.mxu0 %v1397_v49  ;;  %v1484_v49 = vld [vmem:[%s2046_s1 + $0x3e0] ss:$8 sps:$4 sm:$0xff]  }
  0x30   :  { %983 = vmatpush2.bf16.msra.mxu1 %v1398_v50  ;;  %943 = vmatprep.subr.bf16.mxu0 %v1399_v52  ;;  %v1489_v50 = vld [vmem:[%s2046_s1 + $0x2d4] ss:$8 sps:$4 sm:$0xff]   ;;  %v1487_v52 = vld [vmem:[%s2046_s1 + $0x2d0] ss:$8 sps:$4 sm:$0xff]  }
  0x31   :  { %984 = vmatprep.subr.bf16.mxu1 %v1401_v53  ;;  %v1490_v53 = vld [vmem:[%s2046_s1 + $0x3d0] ss:$8 sps:$4 sm:$0xff]  }
  0x33   :  { %944 = vmatpush2.bf16.msra.mxu0 %v1403_v54  ;;  %v1495_v54 = vld [vmem:[%s2046_s1 + $0x2c4] ss:$8 sps:$4 sm:$0xff]  }
  0x34   :  { %985 = vmatpush2.bf16.msra.mxu1 %v1404_v55  ;;  %945 = vmatprep.subr.bf16.mxu0 %v1405_v56  ;;  %v1498_v55 = vld [vmem:[%s2046_s1 + $0x3c4] ss:$8 sps:$4 sm:$0xff]   ;;  %v1493_v56 = vld [vmem:[%s2046_s1 + $0x2c0] ss:$8 sps:$4 sm:$0xff]  }
  0x35   :  { %986 = vmatprep.subr.bf16.mxu1 %v1407_v57  ;;  %v1496_v57 = vld [vmem:[%s2046_s1 + $0x3c0] ss:$8 sps:$4 sm:$0xff]  }
  0x37   :  { %946 = vmatpush2.bf16.msra.mxu0 %v1409_v58  ;;  %v1501_v58 = vld [vmem:[%s2046_s1 + $0x2b4] ss:$8 sps:$4 sm:$0xff]  }
  0x38   :  { %987 = vmatpush2.bf16.msra.mxu1 %v1410_v59  ;;  %947 = vmatprep.subr.bf16.mxu0 %v1411_v60  ;;  %v1504_v59 = vld [vmem:[%s2046_s1 + $0x3b4] ss:$8 sps:$4 sm:$0xff]   ;;  %v1499_v60 = vld [vmem:[%s2046_s1 + $0x2b0] ss:$8 sps:$4 sm:$0xff]  }
  0x39   :  { %988 = vmatprep.subr.bf16.mxu1 %v1413_v61  ;;  %v1502_v61 = vld [vmem:[%s2046_s1 + $0x3b0] ss:$8 sps:$4 sm:$0xff]  }
  0x3b   :  { %948 = vmatpush2.bf16.msra.mxu0 %v1415_v62  ;;  %v1507_v62 = vld [vmem:[%s2046_s1 + $0x2a4] ss:$8 sps:$4 sm:$0xff]  }
  0x3c   :  { %989 = vmatpush2.bf16.msra.mxu1 %v1416_v63  ;;  %949 = vmatprep.subr.bf16.mxu0 %v1417_v0  ;;  %v1510_v63 = vld [vmem:[%s2046_s1 + $0x3a4] ss:$8 sps:$4 sm:$0xff]   ;;  %v1505_v0 = vld [vmem:[%s2046_s1 + $0x2a0] ss:$8 sps:$4 sm:$0xff]  }
  0x3d   :  { %990 = vmatprep.subr.bf16.mxu1 %v1419_v1  ;;  %v1508_v1 = vld [vmem:[%s2046_s1 + $0x3a0] ss:$8 sps:$4 sm:$0xff]  }
  0x3f   :  { %950 = vmatpush2.bf16.msra.mxu0 %v1421_v2  ;;  %v1513_v2 = vld [vmem:[%s2046_s1 + $0x294] ss:$8 sps:$4 sm:$0xff]  }
  0x40   :  { %991 = vmatpush2.bf16.msra.mxu1 %v1422_v3  ;;  %1001 = vmatprep.subr.bf16.mxu0 %v1429_v4  ;;  %v1516_v3 = vld [vmem:[%s2046_s1 + $0x394] ss:$8 sps:$4 sm:$0xff]   ;;  %v1511_v4 = vld [vmem:[%s2046_s1 + $0x290] ss:$8 sps:$4 sm:$0xff]  }
  0x41   :  { %1042 = vmatprep.subr.bf16.mxu1 %v1432_v5  ;;  %v1514_v5 = vld [vmem:[%s2046_s1 + $0x390] ss:$8 sps:$4 sm:$0xff]  }
  0x42   :  { %952 = vmatmul.mubr.bf16.vlgmr.msra.gmra.mxu0 %v1171_v6  ;;  %v1519_v6 = vld [vmem:[%s2046_s1 + $0x284] ss:$8 sps:$4 sm:$0xff]  }
  0x43   :  { %993 = vmatmul.mubr.bf16.vlgmr.msra.gmra.mxu1 %v1173_v7  ;;  %1002 = vmatpush1.bf16.msra.mxu0 %v1427_v8  ;;  %v1522_v7 = vld [vmem:[%s2046_s1 + $0x384] ss:$8 sps:$4 sm:$0xff]   ;;  %v1517_v8 = vld [vmem:[%s2046_s1 + $0x280] ss:$8 sps:$4 sm:$0xff]  }
  0x44   :  { %1043 = vmatpush1.bf16.msra.mxu1 %v1430_v9  ;;  %1003 = vmatprep.subr.bf16.mxu0 %v1435_v10  ;;  %v1520_v9 = vld [vmem:[%s2046_s1 + $0x380] ss:$8 sps:$4 sm:$0xff]   ;;  %v1527_v10 = vld [vmem:[%s2046_s1 + $0x474] ss:$8 sps:$4 sm:$0xff]  }
  0x45   :  { %1044 = vmatprep.subr.bf16.mxu1 %v1438_v11  ;;  %1033 = vmatprep.mubr.bf16.mxu0 %v1176_v35  ;;  %v1175_v11 = vcombine.low %v1857_v32, %v1857_v32 }
  0x46   :  { %1074 = vmatprep.mubr.bf16.mxu1 %v1178_v38 }
  0x47   :  { %1004 = vmatpush1.bf16.msra.mxu0 %v1433_v12  ;;  %v1177_v12 = vcombine.low %v1870_v36, %v1870_v36 }
  0x48   :  { %1045 = vmatpush1.bf16.msra.mxu1 %v1436_v13  ;;  %1005 = vmatprep.subr.bf16.mxu0 %v1441_v14  ;;  %v1525_v13 = vld [vmem:[%s2046_s1 + $0x470] ss:$8 sps:$4 sm:$0xff]   ;;  %v1532_v14 = vld [vmem:[%s2046_s1 + $0x464] ss:$8 sps:$4 sm:$0xff]  }
  0x49   :  { %1046 = vmatprep.subr.bf16.mxu1 %v1444_v15  ;;  %v1530_v15 = vld [vmem:[%s2046_s1 + $0x460] ss:$8 sps:$4 sm:$0xff]  }
  0x4b   :  { %1006 = vmatpush1.bf16.msra.mxu0 %v1439_v16  ;;  %v1552_v16 = vmov 0  }
  0x4c   :  { %1047 = vmatpush1.bf16.msra.mxu1 %v1442_v17  ;;  %1007 = vmatprep.subr.bf16.mxu0 %v1447_v18  ;;  %v1535_v17 = vld [vmem:[%s2046_s1 + $0x454] ss:$8 sps:$4 sm:$0xff]   ;;  %v1533_v18 = vld [vmem:[%s2046_s1 + $0x450] ss:$8 sps:$4 sm:$0xff]  }
  0x4d   :  { %1048 = vmatprep.subr.bf16.mxu1 %v1450_v19  ;;  %v1538_v19 = vld [vmem:[%s2046_s1 + $0x444] ss:$8 sps:$4 sm:$0xff]  }
  0x4f   :  { %1008 = vmatpush1.bf16.msra.mxu0 %v1445_v20  ;;  %v1536_v20 = vld [vmem:[%s2046_s1 + $0x440] ss:$8 sps:$4 sm:$0xff]  }
  0x50   :  { %1049 = vmatpush1.bf16.msra.mxu1 %v1448_v21  ;;  %1009 = vmatprep.subr.bf16.mxu0 %v1453_v22  ;;  %v1541_v21 = vld [vmem:[%s2046_s1 + $0x434] ss:$8 sps:$4 sm:$0xff]   ;;  %v1539_v22 = vld [vmem:[%s2046_s1 + $0x430] ss:$8 sps:$4 sm:$0xff]  }
  0x51   :  { %1050 = vmatprep.subr.bf16.mxu1 %v1456_v23  ;;  %v1544_v23 = vld [vmem:[%s2046_s1 + $0x424] ss:$8 sps:$4 sm:$0xff]  }
  0x53   :  { %1010 = vmatpush1.bf16.msra.mxu0 %v1451_v24  ;;  %v1542_v24 = vld [vmem:[%s2046_s1 + $0x420] ss:$8 sps:$4 sm:$0xff]  }
  0x54   :  { %1051 = vmatpush1.bf16.msra.mxu1 %v1454_v25  ;;  %1011 = vmatprep.subr.bf16.mxu0 %v1459_v26  ;;  %v1547_v25 = vld [vmem:[%s2046_s1 + $0x414] ss:$8 sps:$4 sm:$0xff]   ;;  %v1545_v26 = vld [vmem:[%s2046_s1 + $0x410] ss:$8 sps:$4 sm:$0xff]  }
  0x55   :  { %1052 = vmatprep.subr.bf16.mxu1 %v1462_v27  ;;  %v1550_v27 = vld [vmem:[%s2046_s1 + $0x404] ss:$8 sps:$4 sm:$0xff]  }
  0x57   :  { %1012 = vmatpush1.bf16.msra.mxu0 %v1457_v28  ;;  %v1548_v28 = vld [vmem:[%s2046_s1 + $0x400] ss:$8 sps:$4 sm:$0xff]  }
  0x58   :  { %1053 = vmatpush1.bf16.msra.mxu1 %v1460_v29  ;;  %1013 = vmatprep.subr.bf16.mxu0 %v1465_v30  ;;  %v1551_v29 = vld [vmem:[%s2047_s0 + $0x20] ss:$0 sps:$4 sm:$0xff]  }
  0x59   :  { %1054 = vmatprep.subr.bf16.mxu1 %v1468_v31 }
  0x5b   :  { %1014 = vmatpush1.bf16.msra.mxu0 %v1463_v33 }
  0x5c   :  { %1055 = vmatpush1.bf16.msra.mxu1 %v1466_v34  ;;  %1015 = vmatprep.subr.bf16.mxu0 %v1471_v37 }
  0x5d   :  { %1056 = vmatprep.subr.bf16.mxu1 %v1474_v39 }
  0x5f   :  { %1016 = vmatpush1.bf16.msra.mxu0 %v1469_v40 }
  0x60   :  { %1057 = vmatpush1.bf16.msra.mxu1 %v1472_v41  ;;  %1017 = vmatprep.subr.bf16.mxu0 %v1477_v42 }
  0x61   :  { %1058 = vmatprep.subr.bf16.mxu1 %v1480_v43 }
  0x63   :  { %1018 = vmatpush2.bf16.msra.mxu0 %v1475_v44 }
  0x64   :  { %1059 = vmatpush2.bf16.msra.mxu1 %v1478_v45  ;;  %1019 = vmatprep.subr.bf16.mxu0 %v1483_v46 }
  0x65   :  { %1060 = vmatprep.subr.bf16.mxu1 %v1486_v47 }
  0x67   :  { %1020 = vmatpush2.bf16.msra.mxu0 %v1481_v48  ;;  %v1126_v48 = vlaneseq }
  0x68   :  { %1061 = vmatpush2.bf16.msra.mxu1 %v1484_v49  ;;  %1021 = vmatprep.subr.bf16.mxu0 %v1489_v50 }
  0x69   :  { %1062 = vmatprep.subr.bf16.mxu1 %v1492_v51  ;;  %v1127_v49 = vshrl.u32 %v1126_v48, 7 }
  0x6b   :  { %1022 = vmatpush2.bf16.msra.mxu0 %v1487_v52  ;;  %v1128_v51 = vsub.s32 0, %v1127_v49  ;;  %v1124_v52 = vld [vmem:[%s2048_s2] sm:$0x3] }
  0x6c   :  { %1063 = vmatpush2.bf16.msra.mxu1 %v1490_v53  ;;  %1023 = vmatprep.subr.bf16.mxu0 %v1495_v54  ;;  %v1132_v54 = vsub.s32 1, %v1127_v49 }
  0x6d   :  { %1064 = vmatprep.subr.bf16.mxu1 %v1498_v55  ;;  %v1138_v55 = vld [vmem:[%s2049_s3] sm:$0x3] }
  0x6f   :  { %1024 = vmatpush2.bf16.msra.mxu0 %v1493_v56 }
  0x70   :  { %1065 = vmatpush2.bf16.msra.mxu1 %v1496_v57  ;;  %1025 = vmatprep.subr.bf16.mxu0 %v1501_v58  ;;  %v1129_v57 = vrot.slane %v1124_v52, %v1128_v51 }
  0x71   :  { %1066 = vmatprep.subr.bf16.mxu1 %v1504_v59 }
  0x73   :  { %1026 = vmatpush2.bf16.msra.mxu0 %v1499_v60 }
  0x74   :  { %1067 = vmatpush2.bf16.msra.mxu1 %v1502_v61  ;;  %1027 = vmatprep.subr.bf16.mxu0 %v1507_v62  ;;  %v1143_v61 = vrot.slane %v1138_v55, %v1128_v51  ;;  %v1133_v62 = vrot.slane %v1124_v52, %v1132_v54 }
  0x75   :  { %1068 = vmatprep.subr.bf16.mxu1 %v1510_v63 }
  0x77   :  { %1028 = vmatpush2.bf16.msra.mxu0 %v1505_v0 }
  0x78   :  { %1069 = vmatpush2.bf16.msra.mxu1 %v1508_v1  ;;  %1029 = vmatprep.subr.bf16.mxu0 %v1513_v2  ;;  %v1147_v2 = vrot.slane %v1138_v55, %v1132_v54 }
  0x79   :  { %1070 = vmatprep.subr.bf16.mxu1 %v1516_v3 }
  0x7b   :  { %1030 = vmatpush2.bf16.msra.mxu0 %v1511_v4 }
  0x7c   :  { %1071 = vmatpush2.bf16.msra.mxu1 %v1514_v5  ;;  %1031 = vmatprep.subr.bf16.mxu0 %v1519_v6 }
  0x7d   :  { %1072 = vmatprep.subr.bf16.mxu1 %v1522_v7 }
  0x7f   :  { %1032 = vmatpush2.bf16.msra.mxu0 %v1517_v8 }
  0x80   :  { %1073 = vmatpush2.bf16.msra.mxu1 %v1520_v9  ;;  %1083 = vmatprep.subr.bf16.mxu0 %v1527_v10 }
  0x82   :  { %1034 = vmatmul.mubr.bf16.vlgmr.msra.gmra.mxu0 %v1175_v11 }
  0x83   :  { %1075 = vmatmul.mubr.bf16.vlgmr.msra.gmra.mxu1 %v1177_v12  ;;  %1084 = vmatpush1.bf16.msra.mxu0 %v1525_v13 }
  0x84   :  { %1115 = vmatprep.mubr.bf16.mxu0 %v1552_v16  ;;  %1085 = vmatprep.subr.bf16.mxu0 %v1532_v14 }
  0x87   :  { %1086 = vmatpush1.bf16.msra.mxu0 %v1530_v15 }
  0x88   :  { %1087 = vmatprep.subr.bf16.mxu0 %v1535_v17 }
  0x8b   :  { %1088 = vmatpush1.bf16.msra.mxu0 %v1533_v18 }
  0x8c   :  { %1089 = vmatprep.subr.bf16.mxu0 %v1538_v19 }
  0x8f   :  { %1090 = vmatpush1.bf16.msra.mxu0 %v1536_v20 }
  0x90   :  { %1091 = vmatprep.subr.bf16.mxu0 %v1541_v21 }
  0x93   :  { %1092 = vmatpush1.bf16.msra.mxu0 %v1539_v22 }
  0x94   :  { %1093 = vmatprep.subr.bf16.mxu0 %v1544_v23 }
  0x97   :  { %1094 = vmatpush1.bf16.msra.mxu0 %v1542_v24 }
  0x98   :  { %1095 = vmatprep.subr.bf16.mxu0 %v1547_v25 }
  0x9b   :  { %1096 = vmatpush1.bf16.msra.mxu0 %v1545_v26 }
  0x9c   :  { %1097 = vmatprep.subr.bf16.mxu0 %v1550_v27 }
  0x9f   :  { %1098 = vmatpush1.bf16.msra.mxu0 %v1548_v28 }
  0xa2   :  { %1116 = vmatmul.mubr.bf16.vlgmr.msra.gmra.mxu0 %v1551_v29 }
 0x102   :  { %v953_v30 = vpop.f32.mrf.mxu0 }
 0x103   :  { %v994_v31 = vpop.f32.mrf.mxu1 }
 0x104   :  { %v995_v32 = vadd.f32 %v994_v31, %v953_v30  ;;  %v955_v33 = vpop.f32.mrf.mxu0 }
 0x105   :  { %v996_v34 = vpop.f32.mrf.mxu1 }
 0x106   :  { %v997_v35 = vadd.f32 %v996_v34, %v955_v33  ;;  %v957_v36 = vpop.f32.mrf.mxu0 }
 0x107   :  { %v998_v37 = vpop.f32.mrf.mxu1 }
 0x108   :  { %v958_v38 = vpop.f32.mrf.mxu0 }
 0x109   :  { %v999_v39 = vpop.f32.mrf.mxu1 }
 0x142   :  { %v1035_v40 = vpop.f32.mrf.mxu0 }
 0x143   :  { %v1076_v41 = vpop.f32.mrf.mxu1  ;;  %v1036_v50 = vadd.f32 %v1035_v40, %v995_v32 }
 0x144   :  { %v1037_v42 = vpop.f32.mrf.mxu0 }
 0x145   :  { %v1078_v43 = vpop.f32.mrf.mxu1  ;;  %v1038_v53 = vadd.f32 %v1037_v42, %v997_v35  ;;  %v1077_v56 = vadd.f32 %v1076_v41, %v1036_v50 }
 0x146   :  { %v1039_v44 = vpop.f32.mrf.mxu0 }
 0x147   :  { %v1080_v45 = vpop.f32.mrf.mxu1  ;;  %v1079_v59 = vadd.f32 %v1078_v43, %v1038_v53 }
 0x148   :  { %v1040_v46 = vpop.f32.mrf.mxu0 }
 0x149   :  { %v1081_v47 = vpop.f32.mrf.mxu1 }
 0x162   :  { %v1117_v58 = vpop.f32.mrf.mxu0 }
 0x163   :  { %v1118_v60 = vadd.f32 %v1117_v58, %v1077_v56 }
 0x164   :  { %v1119_v63 = vpop.f32.mrf.mxu0 }
 0x165   :  { %v1136_v0 = vmul.f32 %v1129_v57, %v1118_v60  ;;  %v1120_v1 = vadd.f32 %v1119_v63, %v1079_v59 }
 0x166   :  { %v1121_v3 = vpop.f32.mrf.mxu0 }
 0x167   :  { %v1150_v4 = vadd.f32 %v1143_v61, %v1136_v0  ;;  %v1137_v5 = vmul.f32 %v1133_v62, %v1120_v1 }
 0x168   :  { %v1122_v6 = vpop.f32.mrf.mxu0 }
 0x169   :  { %v1154_v7 = vmul.f32 0.2, %v1150_v4  ;;  %v1151_v8 = vadd.f32 %v1147_v2, %v1137_v5  ;;  %vm1152_vm0 = vcmp.ge.f32.partialorder %v1150_v4, 0.0 }
 0x16b   :  { %vm1153_vm1 = vcmp.ge.f32.partialorder %v1151_v8, 0.0  ;;  %v1155_v9 = vmul.f32 0.2, %v1151_v8  ;;  %v1156_v10 = vsel %vm1152_vm0, %v1150_v4, %v1154_v7 }
 0x16d   :  { %v1157_v11 = vsel %vm1153_vm1, %v1151_v8, %v1155_v9 }
 0x16e   :  { %v1325_v12 = vpack.c.bf16 %v1157_v11, %v1156_v10 }
 0x170   :  { %1166 = vst [vmem:[%s2050_s4] sm:$0xff] %v1325_v12 }

// kernel: discriminator3d_forward.9
= control target key start
LH: loop header
LB: loop body
LE: loop exit
PB: predicated region body
PF: predicated region fallthrough
CT: control target
= control target key end

     0   :  { %v966_v22 = vmov 1966171168   ;;  %v146_v24 = vlaneseq  ;;  %s1193_s1 = inlined_call_operand.vmem [shape: bf16[1024,128], index: 1, kind: input, shape index: {}]   ;;  %s1194_s0 = inlined_call_operand.vmem [shape: bf16[2,1024], index: 0, kind: input, shape index: {}]   ;;  %s1195_s2 = inlined_call_operand.vmem [shape: f32[2,128], index: 2, kind: output, shape index: {}]  }
   0x1   :  { %v901_v0 = vld [vmem:[%s1193_s1 + $0x78] sm:$0xff]   ;;  %v905_v4 = vld [vmem:[%s1193_s1 + $0x70] sm:$0xff]   ;;  %v909_v8 = vld [vmem:[%s1193_s1 + $0x68] sm:$0xff]   ;;  %v144_v23 = vunpack.c.l.s4 %v966_v22 }
   0x2   :  { %v902_v1 = vld [vmem:[%s1193_s1 + $0xf8] sm:$0xff]   ;;  %812 = vmatprep.subr.bf16.mxu0 %v901_v0  ;;  %v906_v5 = vld [vmem:[%s1193_s1 + $0xf0] sm:$0xff]   ;;  %v910_v9 = vld [vmem:[%s1193_s1 + $0xe8] sm:$0xff]   ;;  %v147_v30 = vshrl.u32 %v146_v24, 7 }
   0x3   :  { %v903_v2 = vld [vmem:[%s1193_s1 + $0x38] sm:$0xff]   ;;  %834 = vmatprep.subr.bf16.mxu1 %v902_v1  ;;  %v907_v6 = vld [vmem:[%s1193_s1 + $0x30] sm:$0xff]   ;;  %v911_v10 = vld [vmem:[%s1193_s1 + $0x28] sm:$0xff]   ;;  %v145_v29 = vunpack.c.0.s8 %v144_v23 }
   0x4   :  { %v904_v3 = vld [vmem:[%s1193_s1 + $0xb8] sm:$0xff]   ;;  %813 = vmatpush3.bf16.msra.mxu0 %v903_v2  ;;  %v908_v7 = vld [vmem:[%s1193_s1 + $0xb0] sm:$0xff]   ;;  %v912_v11 = vld [vmem:[%s1193_s1 + $0xa8] sm:$0xff]  }
   0x5   :  { %835 = vmatpush3.bf16.msra.mxu1 %v904_v3  ;;  %814 = vmatprep.subr.bf16.mxu0 %v905_v4  ;;  %v913_v12 = vld [vmem:[%s1193_s1 + $0x60] sm:$0xff]   ;;  %v917_v16 = vld [vmem:[%s1193_s1 + $0x58] sm:$0xff]   ;;  %v921_v20 = vld [vmem:[%s1193_s1 + $0x50] sm:$0xff]   ;;  %v1072_v35 = vsub.s32 %v145_v29, %v147_v30 }
   0x6   :  { %836 = vmatprep.subr.bf16.mxu1 %v906_v5  ;;  %v914_v13 = vld [vmem:[%s1193_s1 + $0xe0] sm:$0xff]   ;;  %v918_v17 = vld [vmem:[%s1193_s1 + $0xd8] sm:$0xff]   ;;  %v922_v21 = vld [vmem:[%s1193_s1 + $0xd0] sm:$0xff]  }
   0x7   :  { %v915_v14 = vld [vmem:[%s1193_s1 + $0x20] sm:$0xff]   ;;  %v919_v18 = vld [vmem:[%s1193_s1 + $0x18] sm:$0xff]   ;;  %v923_v25 = vld [vmem:[%s1193_s1 + $0x10] sm:$0xff]  }
   0x8   :  { %815 = vmatpush3.bf16.msra.mxu0 %v907_v6  ;;  %v916_v15 = vld [vmem:[%s1193_s1 + $0xa0] sm:$0xff]   ;;  %v920_v19 = vld [vmem:[%s1193_s1 + $0x98] sm:$0xff]   ;;  %v924_v26 = vld [vmem:[%s1193_s1 + $0x90] sm:$0xff]  }
   0x9   :  { %837 = vmatpush3.bf16.msra.mxu1 %v908_v7  ;;  %816 = vmatprep.subr.bf16.mxu0 %v909_v8  ;;  %v925_v27 = vld [vmem:[%s1193_s1 + $0x48] sm:$0xff]   ;;  %v929_v33 = vld [vmem:[%s1193_s1 + $0x40] sm:$0xff]   ;;  %v934_v41 = vld [vmem:[%s1193_s1 + $0x178] sm:$0xff]  }
   0xa   :  { %838 = vmatprep.subr.bf16.mxu1 %v910_v9  ;;  %v926_v28 = vld [vmem:[%s1193_s1 + $0xc8] sm:$0xff]   ;;  %v930_v34 = vld [vmem:[%s1193_s1 + $0xc0] sm:$0xff]   ;;  %v935_v42 = vld [vmem:[%s1193_s1 + $0x1f8] sm:$0xff]  }
   0xb   :  { %v927_v31 = vld [vmem:[%s1193_s1 + $0x8] sm:$0xff]   ;;  %v931_v36 = vld [vmem:[%s1193_s1] sm:$0xff]   ;;  %v936_v47 = vld [vmem:[%s1193_s1 + $0x138] sm:$0xff]  }
   0xc   :  { %817 = vmatpush3.bf16.msra.mxu0 %v911_v10  ;;  %v928_v32 = vld [vmem:[%s1193_s1 + $0x88] sm:$0xff]   ;;  %v932_v37 = vld [vmem:[%s1193_s1 + $0x80] sm:$0xff]   ;;  %v938_v50 = vld [vmem:[%s1193_s1 + $0x170] sm:$0xff]  }
   0xd   :  { %839 = vmatpush3.bf16.msra.mxu1 %v912_v11  ;;  %818 = vmatprep.subr.bf16.mxu0 %v913_v12  ;;  %v12_v38 = vld [vmem:[%s1194_s0] sm:$0xff]  ;;  %v937_v52 = vld [vmem:[%s1193_s1 + $0x1b8] sm:$0xff]   ;;  %v939_v54 = vld [vmem:[%s1193_s1 + $0x1f0] sm:$0xff]  }
   0xe   :  { %840 = vmatprep.subr.bf16.mxu1 %v914_v13  ;;  %v142_v39 = vcombine.high %v12_v38, %v12_v38  ;;  %v149_v40 = vrot.slane %v12_v38, %v1072_v35  ;;  %v940_v55 = vld [vmem:[%s1193_s1 + $0x130] sm:$0xff]   ;;  %v942_v57 = vld [vmem:[%s1193_s1 + $0x168] sm:$0xff]   ;;  %v946_v61 = vld [vmem:[%s1193_s1 + $0x160] sm:$0xff]  }
   0xf   :  { %v941_v58 = vld [vmem:[%s1193_s1 + $0x1b0] sm:$0xff]   ;;  %v943_v59 = vld [vmem:[%s1193_s1 + $0x1e8] sm:$0xff]   ;;  %v947_v63 = vld [vmem:[%s1193_s1 + $0x1e0] sm:$0xff]  }
  0x10   :  { %819 = vmatpush3.bf16.msra.mxu0 %v915_v14  ;;  %v157_v43 = vcombine.high %v149_v40, %v149_v40  ;;  %v165_v44 = vrot.slane %v149_v40, %v1072_v35  ;;  %v1092_v45 = vrot.slane %v142_v39, %v1072_v35  ;;  %v944_v60 = vld [vmem:[%s1193_s1 + $0x128] sm:$0xff]   ;;  %v948_v0 = vld [vmem:[%s1193_s1 + $0x120] sm:$0xff]   ;;  %v950_v1 = vld [vmem:[%s1193_s1 + $0x158] sm:$0xff]  }
  0x11   :  { %841 = vmatpush3.bf16.msra.mxu1 %v916_v15  ;;  %820 = vmatprep.subr.bf16.mxu0 %v917_v16  ;;  %v945_v62 = vld [vmem:[%s1193_s1 + $0x1a8] sm:$0xff]   ;;  %v949_v2 = vld [vmem:[%s1193_s1 + $0x1a0] sm:$0xff]   ;;  %v951_v3 = vld [vmem:[%s1193_s1 + $0x1d8] sm:$0xff]  }
  0x12   :  { %842 = vmatprep.subr.bf16.mxu1 %v918_v17  ;;  %v179_v46 = vrot.slane %v157_v43, %v1072_v35  ;;  %v158_v48 = vcombine.high %v1092_v45, %v1092_v45  ;;  %v187_v49 = vcombine.high %v165_v44, %v165_v44  ;;  %v952_v4 = vld [vmem:[%s1193_s1 + $0x118] sm:$0xff]   ;;  %v954_v5 = vld [vmem:[%s1193_s1 + $0x150] sm:$0xff]   ;;  %v958_v9 = vld [vmem:[%s1193_s1 + $0x148] sm:$0xff]   ;;  %v172_v17 = vrot.slane %v1092_v45, %v1072_v35 }
  0x13   :  { %v953_v6 = vld [vmem:[%s1193_s1 + $0x198] sm:$0xff]   ;;  %v955_v7 = vld [vmem:[%s1193_s1 + $0x1d0] sm:$0xff]   ;;  %v959_v11 = vld [vmem:[%s1193_s1 + $0x1c8] sm:$0xff]  }
  0x14   :  { %821 = vmatpush3.bf16.msra.mxu0 %v919_v18  ;;  %615 = vmatprep.mubr.bf16.mxu0 %v179_v46  ;;  %v189_v51 = vcombine.high %v179_v46, %v179_v46  ;;  %v186_v53 = vrot.slane %v158_v48, %v1072_v35  ;;  %v956_v8 = vld [vmem:[%s1193_s1 + $0x110] sm:$0xff]   ;;  %v960_v12 = vld [vmem:[%s1193_s1 + $0x108] sm:$0xff]   ;;  %v962_v13 = vld [vmem:[%s1193_s1 + $0x140] sm:$0xff]  }
  0x15   :  { %843 = vmatpush3.bf16.msra.mxu1 %v920_v19  ;;  %822 = vmatprep.subr.bf16.mxu0 %v921_v20  ;;  %v957_v10 = vld [vmem:[%s1193_s1 + $0x190] sm:$0xff]   ;;  %v961_v14 = vld [vmem:[%s1193_s1 + $0x188] sm:$0xff]   ;;  %v963_v15 = vld [vmem:[%s1193_s1 + $0x1c0] sm:$0xff]   ;;  %v188_v19 = vcombine.high %v172_v17, %v172_v17 }
  0x16   :  { %844 = vmatprep.subr.bf16.mxu1 %v922_v21  ;;  %655 = vmatprep.mubr.bf16.mxu1 %v189_v51  ;;  %v190_v56 = vcombine.high %v186_v53, %v186_v53  ;;  %v964_v16 = vld [vmem:[%s1193_s1 + $0x100] sm:$0xff]  }
  0x17   :  { %v965_v18 = vld [vmem:[%s1193_s1 + $0x180] sm:$0xff]  }
  0x18   :  { %823 = vmatpush3.bf16.msra.mxu0 %v923_v25 }
  0x19   :  { %845 = vmatpush3.bf16.msra.mxu1 %v924_v26  ;;  %824 = vmatprep.subr.bf16.mxu0 %v925_v27 }
  0x1a   :  { %846 = vmatprep.subr.bf16.mxu1 %v926_v28 }
  0x1c   :  { %825 = vmatpush3.bf16.msra.mxu0 %v927_v31 }
  0x1d   :  { %847 = vmatpush3.bf16.msra.mxu1 %v928_v32  ;;  %826 = vmatprep.subr.bf16.mxu0 %v929_v33 }
  0x1e   :  { %848 = vmatprep.subr.bf16.mxu1 %v930_v34 }
  0x20   :  { %827 = vmatpush3.bf16.msra.mxu0 %v931_v36 }
  0x21   :  { %849 = vmatpush3.bf16.msra.mxu1 %v932_v37  ;;  %856 = vmatprep.subr.bf16.mxu0 %v934_v41 }
  0x22   :  { %878 = vmatprep.subr.bf16.mxu1 %v935_v42 }
  0x23   :  { %616 = vmatmul.mubr.bf16.vlgmr.msra.gmra.mxu0 %v165_v44 }
  0x24   :  { %857 = vmatpush3.bf16.msra.mxu0 %v936_v47  ;;  %656 = vmatmul.mubr.bf16.vlgmr.msra.gmra.mxu1 %v187_v49 }
  0x25   :  { %858 = vmatprep.subr.bf16.mxu0 %v938_v50  ;;  %879 = vmatpush3.bf16.msra.mxu1 %v937_v52 }
  0x26   :  { %695 = vmatprep.mubr.bf16.mxu0 %v186_v53  ;;  %880 = vmatprep.subr.bf16.mxu1 %v939_v54 }
  0x27   :  { %735 = vmatprep.mubr.bf16.mxu1 %v190_v56 }
  0x28   :  { %859 = vmatpush3.bf16.msra.mxu0 %v940_v55 }
  0x29   :  { %860 = vmatprep.subr.bf16.mxu0 %v942_v57  ;;  %881 = vmatpush3.bf16.msra.mxu1 %v941_v58 }
  0x2a   :  { %882 = vmatprep.subr.bf16.mxu1 %v943_v59 }
  0x2c   :  { %861 = vmatpush3.bf16.msra.mxu0 %v944_v60 }
  0x2d   :  { %862 = vmatprep.subr.bf16.mxu0 %v946_v61  ;;  %883 = vmatpush3.bf16.msra.mxu1 %v945_v62 }
  0x2e   :  { %884 = vmatprep.subr.bf16.mxu1 %v947_v63 }
  0x30   :  { %863 = vmatpush3.bf16.msra.mxu0 %v948_v0 }
  0x31   :  { %864 = vmatprep.subr.bf16.mxu0 %v950_v1  ;;  %885 = vmatpush3.bf16.msra.mxu1 %v949_v2 }
  0x32   :  { %886 = vmatprep.subr.bf16.mxu1 %v951_v3 }
  0x34   :  { %865 = vmatpush3.bf16.msra.mxu0 %v952_v4 }
  0x35   :  { %866 = vmatprep.subr.bf16.mxu0 %v954_v5  ;;  %887 = vmatpush3.bf16.msra.mxu1 %v953_v6 }
  0x36   :  { %888 = vmatprep.subr.bf16.mxu1 %v955_v7 }
  0x38   :  { %867 = vmatpush3.bf16.msra.mxu0 %v956_v8 }
  0x39   :  { %868 = vmatprep.subr.bf16.mxu0 %v958_v9  ;;  %889 = vmatpush3.bf16.msra.mxu1 %v957_v10 }
  0x3a   :  { %890 = vmatprep.subr.bf16.mxu1 %v959_v11 }
  0x3c   :  { %869 = vmatpush3.bf16.msra.mxu0 %v960_v12 }
  0x3d   :  { %870 = vmatprep.subr.bf16.mxu0 %v962_v13  ;;  %891 = vmatpush3.bf16.msra.mxu1 %v961_v14 }
  0x3e   :  { %892 = vmatprep.subr.bf16.mxu1 %v963_v15 }
  0x40   :  { %871 = vmatpush3.bf16.msra.mxu0 %v964_v16 }
  0x41   :  { %893 = vmatpush3.bf16.msra.mxu1 %v965_v18 }
  0x43   :  { %696 = vmatmul.mubr.bf16.vlgmr.msra.gmra.mxu0 %v172_v17 }
  0x44   :  { %736 = vmatmul.mubr.bf16.vlgmr.msra.gmra.mxu1 %v188_v19 }
  0xe3   :  { %v828_v20 = vpop.f32.mrf.mxu0 }
  0xe4   :  { %v850_v21 = vpop.f32.mrf.mxu1 }
  0xe5   :  { %v829_v22 = vpop.f32.mrf.mxu0 }
  0xe6   :  { %v851_v23 = vpop.f32.mrf.mxu1  ;;  %v830_v28 = vadd.f32 %v829_v22, %v828_v20 }
  0xe7   :  { %v831_v24 = vpop.f32.mrf.mxu0  ;;  %v852_v29 = vadd.f32 %v851_v23, %v850_v21 }
  0xe8   :  { %v853_v25 = vpop.f32.mrf.mxu1 }
  0xe9   :  { %v832_v26 = vpop.f32.mrf.mxu0  ;;  %v658_v33 = vadd.f32 %v852_v29, %v830_v28 }
  0xea   :  { %v854_v27 = vpop.f32.mrf.mxu1 }
 0x103   :  { %v872_v30 = vpop.f32.mrf.mxu0 }
 0x104   :  { %v894_v31 = vpop.f32.mrf.mxu1 }
 0x105   :  { %v873_v32 = vpop.f32.mrf.mxu0 }
 0x106   :  { %v874_v34 = vadd.f32 %v873_v32, %v872_v30  ;;  %v895_v35 = vpop.f32.mrf.mxu1 }
 0x107   :  { %v875_v36 = vpop.f32.mrf.mxu0  ;;  %v896_v38 = vadd.f32 %v895_v35, %v894_v31 }
 0x108   :  { %v698_v37 = vadd.f32 %v874_v34, %v658_v33  ;;  %v897_v39 = vpop.f32.mrf.mxu1 }
 0x109   :  { %v876_v40 = vpop.f32.mrf.mxu0 }
 0x10a   :  { %v738_v41 = vadd.f32 %v896_v38, %v698_v37  ;;  %v898_v42 = vpop.f32.mrf.mxu1 }
 0x10c   :  { %743 = vst [vmem:[%s1195_s2] sm:$0x3] %v738_v41 }

</bundles_post_ra>
